<compile_context>
chip_gen: v5e
topology: v5e:2x2
jax: 0.10.0
libtpu: 0.0.40
codegen_flags: <defaults>
</compile_context>

<pallas_src>
import functools

import jax
import jax.numpy as jnp
import numpy as np
from jax.experimental import pallas as pl
from jax.experimental.pallas import tpu as pltpu


def _resblock_kernel(x_ref, mask_ref, w1_ref, b1_ref, w2_ref, b2_ref,
                     w3_ref, b3_ref, out_ref, col_ref, *, C, W, lane_width):
    """One (C, L) slab (Bb images, batch folded into lanes) per grid step.

    x_ref    : (C, L)     f32  activations, channels in sublanes, pixels in lanes
    mask_ref : (9, 1, L)  f32  per-tap validity masks (1.0 valid, 0.0 at padding
                               / image boundaries), built at trace time
    w1_ref   : (C, 9*C)   f32  3x3 conv #1 weights, im2col layout (c_out, k*C + c_in)
    b1_ref   : (C, 1)     f32
    w2_ref   : (C, 9*C)   f32  3x3 conv #2 weights
    b2_ref   : (C, 1)     f32
    w3_ref   : (C, C)     f32  1x1 conv weights (c_out, c_in)
    b3_ref   : (C, 1)     f32
    out_ref  : (C, L)     f32
    col_ref  : (9*C, L)   f32  VMEM scratch holding the im2col taps
    """
    x = x_ref[...]                                     # (C, L)

    def conv3x3(a, w_ref, b_ref):
        # Pack the 9 taps into col_ref, then a single MXU matmul.
        for kh in range(3):
            for kw in range(3):
                k = kh * 3 + kw
                s = (kh - 1) * W + (kw - 1)            # lane offset of this tap
                if s == 0:
                    tap = a                            # center tap: no shift, no mask
                else:
                    # y[:, p] = a[:, p + s]; roll is circular, wrapped-in lanes
                    # (image top/bottom rows, row ends, cross-image) are killed
                    # by the precomputed mask.
                    tap = (pltpu.roll(a, shift=(-s) % lane_width, axis=1)
                           * mask_ref[k])
                col_ref[pl.ds(k * C, C), :] = tap      # static start, static size
        return (jnp.dot(w_ref[...], col_ref[...],
                        preferred_element_type=jnp.float32,
                        precision=jax.lax.Precision.HIGHEST)
                + b_ref[...])

    h1 = jnp.maximum(conv3x3(x, w1_ref, b1_ref), 0.0)
    h2 = jnp.maximum(conv3x3(h1, w2_ref, b2_ref), 0.0)
    h3 = (jnp.dot(w3_ref[...], h2,
                  preferred_element_type=jnp.float32,
                  precision=jax.lax.Precision.HIGHEST)
          + b3_ref[...])
    out_ref[...] = h3 + x                              # residual connection


def _tap_masks(H, W, images_per_block):
    """(9, 1, Bb*H*W) f32 validity masks for the 9 conv taps (trace-time numpy)."""
    HW = H * W
    p = np.arange(images_per_block * HW)
    p_local = p % HW                                   # position inside own image
    hh = p_local // W
    ww = p_local % W
    masks = np.empty((9, 1, images_per_block * HW), np.float32)
    for kh in range(3):
        for kw in range(3):
            dh, dw = kh - 1, kw - 1
            valid = ((hh + dh >= 0) & (hh + dh < H) &
                     (ww + dw >= 0) & (ww + dw < W))
            masks[kh * 3 + kw, 0] = valid.astype(np.float32)
    return masks


def resblock_forward(x_nchw, w1, b1, w2, b2, w3, b3, *, images_per_block=None):
    """ResBlock_v1 forward.  x_nchw: (B, C, H, W); conv params in PyTorch layout."""
    B, C, H, W = x_nchw.shape
    HW = H * W

    # --- how many images share one grid step ------------------------------
    # Keep >= 2 grid steps when B >= 2 (v7x megacore); otherwise fold the
    # whole batch into a single lane-dense slab.
    if images_per_block is None:
        images_per_block = B // 2 if (B >= 2 and B % 2 == 0) else B
    Bb = images_per_block
    if B % Bb != 0 or (Bb != B and (Bb * HW) % 128 != 0):
        Bb = B                     # full-array lane block is always legal
    num_blocks = B // Bb
    L = Bb * HW

    # --- layout glue (a few KB of HBM traffic) ----------------------------
    # Batch folded into lanes: (B, C, H, W) -> (C, B*H*W).
    x_lanes = jnp.transpose(x_nchw.astype(jnp.float32),
                            (1, 0, 2, 3)).reshape(C, B * HW)

    # (C_out, C_in, 3, 3) -> (C_out, (kh*3+kw)*C + c_in): im2col weight layout,
    # matching the col_ref row ordering in the kernel.  Tiny, done once.
    w1_f = jnp.transpose(w1, (0, 2, 3, 1)).reshape(C, 9 * C).astype(jnp.float32)
    w2_f = jnp.transpose(w2, (0, 2, 3, 1)).reshape(C, 9 * C).astype(jnp.float32)
    w3_f = w3.reshape(C, C).astype(jnp.float32)
    b1_c = b1.reshape(C, 1).astype(jnp.float32)
    b2_c = b2.reshape(C, 1).astype(jnp.float32)
    b3_c = b3.reshape(C, 1).astype(jnp.float32)
    masks = jnp.asarray(_tap_masks(H, W, Bb))          # (9, 1, L)

    resident = lambda shape: pl.BlockSpec(shape, lambda i, _s=shape: (0,) * len(_s))

    out_lanes = pl.pallas_call(
        functools.partial(_resblock_kernel, C=C, W=W, lane_width=L),
        out_shape=jax.ShapeDtypeStruct((C, B * HW), jnp.float32),
        grid_spec=pltpu.PrefetchScalarGridSpec(
            num_scalar_prefetch=0,
            grid=(num_blocks,),
            in_specs=[
                pl.BlockSpec((C, L), lambda i: (0, i)),   # x slab (Bb images)
                resident((9, 1, L)),                       # tap masks (resident)
                resident((C, 9 * C)),                      # w1
                resident((C, 1)),                          # b1
                resident((C, 9 * C)),                      # w2
                resident((C, 1)),                          # b2
                resident((C, C)),                          # w3
                resident((C, 1)),                          # b3
            ],
            out_specs=pl.BlockSpec((C, L), lambda i: (0, i)),
            scratch_shapes=[pltpu.VMEM((9 * C, L), jnp.float32)],
        ),
        compiler_params=pltpu.CompilerParams(
            dimension_semantics=("parallel",)),
    )(x_lanes, masks, w1_f, b1_c, w2_f, b2_c, w3_f, b3_c)

    return jnp.transpose(out_lanes.reshape(C, B, H, W), (1, 0, 2, 3))


def _reference_forward(x, w1, b1, w2, b2, w3, b3):
    """Pure-JAX reference matching the PyTorch ResBlock_v1 forward."""
    dn = ('NCHW', 'OIHW', 'NCHW')

    def conv(a, w, b, pad):
        y = jax.lax.conv_general_dilated(
            a, w, window_strides=(1, 1), padding=pad, dimension_numbers=dn,
            precision=jax.lax.Precision.HIGHEST)
        return y + b.reshape(1, -1, 1, 1)

    y = jax.nn.relu(conv(x, w1, b1, ((1, 1), (1, 1))))
    y = jax.nn.relu(conv(y, w2, b2, ((1, 1), (1, 1))))
    y = conv(y, w3, b3, ((0, 0), (0, 0)))
    return y + x


if __name__ == "__main__":
    B, chan, H, W = 2, 4, 16, 16

    keys = jax.random.split(jax.random.PRNGKey(0), 7)
    x = jax.random.normal(keys[0], (B, chan, H, W), jnp.float32)
    w1 = jax.random.normal(keys[1], (chan, chan, 3, 3), jnp.float32) * 0.2
    b1 = jax.random.normal(keys[2], (chan,), jnp.float32) * 0.1
    w2 = jax.random.normal(keys[3], (chan, chan, 3, 3), jnp.float32) * 0.2
    b2 = jax.random.normal(keys[4], (chan,), jnp.float32) * 0.1
    w3 = jax.random.normal(keys[5], (chan, chan, 1, 1), jnp.float32) * 0.3
    b3 = jax.random.normal(keys[6], (chan,), jnp.float32) * 0.1

    out = jax.block_until_ready(resblock_forward(x, w1, b1, w2, b2, w3, b3))

    ref = _reference_forward(x, w1, b1, w2, b2, w3, b3)
    np.testing.assert_allclose(np.asarray(out), np.asarray(ref),
                               rtol=1e-4, atol=1e-4)

    print("KERNEL_OK")
</pallas_src>

<mosaic_0001>
module attributes {stable_mosaic.version = 11 : i64} {
  func.func @_resblock_kernel(%arg0: i32, %arg1: memref<4x256xf32, #tpu.memory_space<vmem>>, %arg2: memref<9x1x256xf32, #tpu.memory_space<vmem>>, %arg3: memref<4x36xf32, #tpu.memory_space<vmem>>, %arg4: memref<4x1xf32, #tpu.memory_space<vmem>>, %arg5: memref<4x36xf32, #tpu.memory_space<vmem>>, %arg6: memref<4x1xf32, #tpu.memory_space<vmem>>, %arg7: memref<4x4xf32, #tpu.memory_space<vmem>>, %arg8: memref<4x1xf32, #tpu.memory_space<vmem>>, %arg9: memref<4x256xf32, #tpu.memory_space<vmem>>, %arg10: memref<36x256xf32, #tpu.memory_space<vmem>>) attributes {dimension_semantics = [#tpu.dimension_semantics<parallel>], iteration_bounds = array<i64: 2>, scalar_prefetch = 0 : i64, scratch_operands = 1 : i64, tpu.core_type = #tpu.core_type<tc>, window_params = [{transform_indices = @transform_0, window_bounds = array<i64: 4, 256>}, {pipeline_mode = #tpu.pipeline_mode<synchronous>, transform_indices = @transform_1, window_bounds = array<i64: 9, 1, 256>}, {pipeline_mode = #tpu.pipeline_mode<synchronous>, transform_indices = @transform_2, window_bounds = array<i64: 4, 36>}, {pipeline_mode = #tpu.pipeline_mode<synchronous>, transform_indices = @transform_3, window_bounds = array<i64: 4, 1>}, {pipeline_mode = #tpu.pipeline_mode<synchronous>, transform_indices = @transform_4, window_bounds = array<i64: 4, 36>}, {pipeline_mode = #tpu.pipeline_mode<synchronous>, transform_indices = @transform_5, window_bounds = array<i64: 4, 1>}, {pipeline_mode = #tpu.pipeline_mode<synchronous>, transform_indices = @transform_6, window_bounds = array<i64: 4, 4>}, {pipeline_mode = #tpu.pipeline_mode<synchronous>, transform_indices = @transform_7, window_bounds = array<i64: 4, 1>}, {transform_indices = @transform_8, window_bounds = array<i64: 4, 256>}]} {
    %c0 = arith.constant 0 : index
    %c0_0 = arith.constant 0 : index
    %0 = vector.load %arg1[%c0, %c0_0] : memref<4x256xf32, #tpu.memory_space<vmem>>, vector<4x256xf32>
    %c17_i32 = arith.constant 17 : i32
    %1 = tpu.dynamic_rotate %0 by %c17_i32 dim 1 : vector<4x256xf32>, i32 -> vector<4x256xf32>
    %c0_1 = arith.constant 0 : index
    %c0_2 = arith.constant 0 : index
    %c0_3 = arith.constant 0 : index
    %2 = vector.load %arg2[%c0_1, %c0_2, %c0_3] : memref<9x1x256xf32, #tpu.memory_space<vmem>>, vector<1x1x256xf32>
    %3 = vector.shape_cast %2 : vector<1x1x256xf32> to vector<1x256xf32>
    %4 = vector.broadcast %3 : vector<1x256xf32> to vector<4x256xf32>
    %5 = arith.mulf %1, %4 : vector<4x256xf32>
    %c0_4 = arith.constant 0 : index
    %c0_5 = arith.constant 0 : index
    %6 = vector.load %arg10[%c0_4, %c0_5] : memref<36x256xf32, #tpu.memory_space<vmem>>, vector<4x256xf32>
    tpu.vector_store %arg10[%c0_4, %c0_5], %5 {strides = array<i32>} : memref<36x256xf32, #tpu.memory_space<vmem>>, vector<4x256xf32>,
    %c16_i32 = arith.constant 16 : i32
    %7 = tpu.dynamic_rotate %0 by %c16_i32 dim 1 : vector<4x256xf32>, i32 -> vector<4x256xf32>
    %c1 = arith.constant 1 : index
    %c0_6 = arith.constant 0 : index
    %c0_7 = arith.constant 0 : index
    %8 = vector.load %arg2[%c1, %c0_6, %c0_7] : memref<9x1x256xf32, #tpu.memory_space<vmem>>, vector<1x1x256xf32>
    %9 = vector.shape_cast %8 : vector<1x1x256xf32> to vector<1x256xf32>
    %10 = vector.broadcast %9 : vector<1x256xf32> to vector<4x256xf32>
    %11 = arith.mulf %7, %10 : vector<4x256xf32>
    %c4 = arith.constant 4 : index
    %c0_8 = arith.constant 0 : index
    %12 = vector.load %arg10[%c4, %c0_8] : memref<36x256xf32, #tpu.memory_space<vmem>>, vector<4x256xf32>
    tpu.vector_store %arg10[%c4, %c0_8], %11 {strides = array<i32>} : memref<36x256xf32, #tpu.memory_space<vmem>>, vector<4x256xf32>,
    %c15_i32 = arith.constant 15 : i32
    %13 = tpu.dynamic_rotate %0 by %c15_i32 dim 1 : vector<4x256xf32>, i32 -> vector<4x256xf32>
    %c2 = arith.constant 2 : index
    %c0_9 = arith.constant 0 : index
    %c0_10 = arith.constant 0 : index
    %14 = vector.load %arg2[%c2, %c0_9, %c0_10] : memref<9x1x256xf32, #tpu.memory_space<vmem>>, vector<1x1x256xf32>
    %15 = vector.shape_cast %14 : vector<1x1x256xf32> to vector<1x256xf32>
    %16 = vector.broadcast %15 : vector<1x256xf32> to vector<4x256xf32>
    %17 = arith.mulf %13, %16 : vector<4x256xf32>
    %c8 = arith.constant 8 : index
    %c0_11 = arith.constant 0 : index
    %18 = vector.load %arg10[%c8, %c0_11] : memref<36x256xf32, #tpu.memory_space<vmem>>, vector<4x256xf32>
    tpu.vector_store %arg10[%c8, %c0_11], %17 {strides = array<i32>} : memref<36x256xf32, #tpu.memory_space<vmem>>, vector<4x256xf32>,
    %c1_i32 = arith.constant 1 : i32
    %19 = tpu.dynamic_rotate %0 by %c1_i32 dim 1 : vector<4x256xf32>, i32 -> vector<4x256xf32>
    %c3 = arith.constant 3 : index
    %c0_12 = arith.constant 0 : index
    %c0_13 = arith.constant 0 : index
    %20 = vector.load %arg2[%c3, %c0_12, %c0_13] : memref<9x1x256xf32, #tpu.memory_space<vmem>>, vector<1x1x256xf32>
    %21 = vector.shape_cast %20 : vector<1x1x256xf32> to vector<1x256xf32>
    %22 = vector.broadcast %21 : vector<1x256xf32> to vector<4x256xf32>
    %23 = arith.mulf %19, %22 : vector<4x256xf32>
    %c12 = arith.constant 12 : index
    %c0_14 = arith.constant 0 : index
    %24 = vector.load %arg10[%c12, %c0_14] : memref<36x256xf32, #tpu.memory_space<vmem>>, vector<4x256xf32>
    tpu.vector_store %arg10[%c12, %c0_14], %23 {strides = array<i32>} : memref<36x256xf32, #tpu.memory_space<vmem>>, vector<4x256xf32>,
    %c16 = arith.constant 16 : index
    %c0_15 = arith.constant 0 : index
    %25 = vector.load %arg10[%c16, %c0_15] : memref<36x256xf32, #tpu.memory_space<vmem>>, vector<4x256xf32>
    tpu.vector_store %arg10[%c16, %c0_15], %0 {strides = array<i32>} : memref<36x256xf32, #tpu.memory_space<vmem>>, vector<4x256xf32>,
    %c255_i32 = arith.constant 255 : i32
    %26 = tpu.dynamic_rotate %0 by %c255_i32 dim 1 : vector<4x256xf32>, i32 -> vector<4x256xf32>
    %c5 = arith.constant 5 : index
    %c0_16 = arith.constant 0 : index
    %c0_17 = arith.constant 0 : index
    %27 = vector.load %arg2[%c5, %c0_16, %c0_17] : memref<9x1x256xf32, #tpu.memory_space<vmem>>, vector<1x1x256xf32>
    %28 = vector.shape_cast %27 : vector<1x1x256xf32> to vector<1x256xf32>
    %29 = vector.broadcast %28 : vector<1x256xf32> to vector<4x256xf32>
    %30 = arith.mulf %26, %29 : vector<4x256xf32>
    %c20 = arith.constant 20 : index
    %c0_18 = arith.constant 0 : index
    %31 = vector.load %arg10[%c20, %c0_18] : memref<36x256xf32, #tpu.memory_space<vmem>>, vector<4x256xf32>
    tpu.vector_store %arg10[%c20, %c0_18], %30 {strides = array<i32>} : memref<36x256xf32, #tpu.memory_space<vmem>>, vector<4x256xf32>,
    %c241_i32 = arith.constant 241 : i32
    %32 = tpu.dynamic_rotate %0 by %c241_i32 dim 1 : vector<4x256xf32>, i32 -> vector<4x256xf32>
    %c6 = arith.constant 6 : index
    %c0_19 = arith.constant 0 : index
    %c0_20 = arith.constant 0 : index
    %33 = vector.load %arg2[%c6, %c0_19, %c0_20] : memref<9x1x256xf32, #tpu.memory_space<vmem>>, vector<1x1x256xf32>
    %34 = vector.shape_cast %33 : vector<1x1x256xf32> to vector<1x256xf32>
    %35 = vector.broadcast %34 : vector<1x256xf32> to vector<4x256xf32>
    %36 = arith.mulf %32, %35 : vector<4x256xf32>
    %c24 = arith.constant 24 : index
    %c0_21 = arith.constant 0 : index
    %37 = vector.load %arg10[%c24, %c0_21] : memref<36x256xf32, #tpu.memory_space<vmem>>, vector<4x256xf32>
    tpu.vector_store %arg10[%c24, %c0_21], %36 {strides = array<i32>} : memref<36x256xf32, #tpu.memory_space<vmem>>, vector<4x256xf32>,
    %c240_i32 = arith.constant 240 : i32
    %38 = tpu.dynamic_rotate %0 by %c240_i32 dim 1 : vector<4x256xf32>, i32 -> vector<4x256xf32>
    %c7 = arith.constant 7 : index
    %c0_22 = arith.constant 0 : index
    %c0_23 = arith.constant 0 : index
    %39 = vector.load %arg2[%c7, %c0_22, %c0_23] : memref<9x1x256xf32, #tpu.memory_space<vmem>>, vector<1x1x256xf32>
    %40 = vector.shape_cast %39 : vector<1x1x256xf32> to vector<1x256xf32>
    %41 = vector.broadcast %40 : vector<1x256xf32> to vector<4x256xf32>
    %42 = arith.mulf %38, %41 : vector<4x256xf32>
    %c28 = arith.constant 28 : index
    %c0_24 = arith.constant 0 : index
    %43 = vector.load %arg10[%c28, %c0_24] : memref<36x256xf32, #tpu.memory_space<vmem>>, vector<4x256xf32>
    tpu.vector_store %arg10[%c28, %c0_24], %42 {strides = array<i32>} : memref<36x256xf32, #tpu.memory_space<vmem>>, vector<4x256xf32>,
    %c239_i32 = arith.constant 239 : i32
    %44 = tpu.dynamic_rotate %0 by %c239_i32 dim 1 : vector<4x256xf32>, i32 -> vector<4x256xf32>
    %c8_25 = arith.constant 8 : index
    %c0_26 = arith.constant 0 : index
    %c0_27 = arith.constant 0 : index
    %45 = vector.load %arg2[%c8_25, %c0_26, %c0_27] : memref<9x1x256xf32, #tpu.memory_space<vmem>>, vector<1x1x256xf32>
    %46 = vector.shape_cast %45 : vector<1x1x256xf32> to vector<1x256xf32>
    %47 = vector.broadcast %46 : vector<1x256xf32> to vector<4x256xf32>
    %48 = arith.mulf %44, %47 : vector<4x256xf32>
    %c32 = arith.constant 32 : index
    %c0_28 = arith.constant 0 : index
    %49 = vector.load %arg10[%c32, %c0_28] : memref<36x256xf32, #tpu.memory_space<vmem>>, vector<4x256xf32>
    tpu.vector_store %arg10[%c32, %c0_28], %48 {strides = array<i32>} : memref<36x256xf32, #tpu.memory_space<vmem>>, vector<4x256xf32>,
    %c0_29 = arith.constant 0 : index
    %c0_30 = arith.constant 0 : index
    %50 = vector.load %arg3[%c0_29, %c0_30] : memref<4x36xf32, #tpu.memory_space<vmem>>, vector<4x36xf32>
    %c0_31 = arith.constant 0 : index
    %c0_32 = arith.constant 0 : index
    %51 = vector.load %arg10[%c0_31, %c0_32] : memref<36x256xf32, #tpu.memory_space<vmem>>, vector<36x256xf32>
    %cst = arith.constant dense<0.000000e+00> : vector<4x256xf32>
    %52 = tpu.matmul %50, %51, %cst {dimension_numbers = #tpu.dot_dimension_numbers<[1], [0], [0], [1], [0, 0, 1, 1], [], []>, precision = #tpu.contract_precision<fp32>} : vector<4x36xf32>, vector<36x256xf32>, vector<4x256xf32> -> vector<4x256xf32>
    %c0_33 = arith.constant 0 : index
    %c0_34 = arith.constant 0 : index
    %53 = vector.load %arg4[%c0_33, %c0_34] : memref<4x1xf32, #tpu.memory_space<vmem>>, vector<4x1xf32>
    %54 = vector.broadcast %53 : vector<4x1xf32> to vector<4x256xf32>
    %55 = arith.addf %52, %54 : vector<4x256xf32>
    %cst_35 = arith.constant 0.000000e+00 : f32
    %56 = vector.broadcast %cst_35 : f32 to vector<4x256xf32>
    %57 = arith.maximumf %55, %56 : vector<4x256xf32>
    %c17_i32_36 = arith.constant 17 : i32
    %58 = tpu.dynamic_rotate %57 by %c17_i32_36 dim 1 : vector<4x256xf32>, i32 -> vector<4x256xf32>
    %c0_37 = arith.constant 0 : index
    %c0_38 = arith.constant 0 : index
    %c0_39 = arith.constant 0 : index
    %59 = vector.load %arg2[%c0_37, %c0_38, %c0_39] : memref<9x1x256xf32, #tpu.memory_space<vmem>>, vector<1x1x256xf32>
    %60 = vector.shape_cast %59 : vector<1x1x256xf32> to vector<1x256xf32>
    %61 = vector.broadcast %60 : vector<1x256xf32> to vector<4x256xf32>
    %62 = arith.mulf %58, %61 : vector<4x256xf32>
    %c0_40 = arith.constant 0 : index
    %c0_41 = arith.constant 0 : index
    %63 = vector.load %arg10[%c0_40, %c0_41] : memref<36x256xf32, #tpu.memory_space<vmem>>, vector<4x256xf32>
    tpu.vector_store %arg10[%c0_40, %c0_41], %62 {strides = array<i32>} : memref<36x256xf32, #tpu.memory_space<vmem>>, vector<4x256xf32>,
    %c16_i32_42 = arith.constant 16 : i32
    %64 = tpu.dynamic_rotate %57 by %c16_i32_42 dim 1 : vector<4x256xf32>, i32 -> vector<4x256xf32>
    %c1_43 = arith.constant 1 : index
    %c0_44 = arith.constant 0 : index
    %c0_45 = arith.constant 0 : index
    %65 = vector.load %arg2[%c1_43, %c0_44, %c0_45] : memref<9x1x256xf32, #tpu.memory_space<vmem>>, vector<1x1x256xf32>
    %66 = vector.shape_cast %65 : vector<1x1x256xf32> to vector<1x256xf32>
    %67 = vector.broadcast %66 : vector<1x256xf32> to vector<4x256xf32>
    %68 = arith.mulf %64, %67 : vector<4x256xf32>
    %c4_46 = arith.constant 4 : index
    %c0_47 = arith.constant 0 : index
    %69 = vector.load %arg10[%c4_46, %c0_47] : memref<36x256xf32, #tpu.memory_space<vmem>>, vector<4x256xf32>
    tpu.vector_store %arg10[%c4_46, %c0_47], %68 {strides = array<i32>} : memref<36x256xf32, #tpu.memory_space<vmem>>, vector<4x256xf32>,
    %c15_i32_48 = arith.constant 15 : i32
    %70 = tpu.dynamic_rotate %57 by %c15_i32_48 dim 1 : vector<4x256xf32>, i32 -> vector<4x256xf32>
    %c2_49 = arith.constant 2 : index
    %c0_50 = arith.constant 0 : index
    %c0_51 = arith.constant 0 : index
    %71 = vector.load %arg2[%c2_49, %c0_50, %c0_51] : memref<9x1x256xf32, #tpu.memory_space<vmem>>, vector<1x1x256xf32>
    %72 = vector.shape_cast %71 : vector<1x1x256xf32> to vector<1x256xf32>
    %73 = vector.broadcast %72 : vector<1x256xf32> to vector<4x256xf32>
    %74 = arith.mulf %70, %73 : vector<4x256xf32>
    %c8_52 = arith.constant 8 : index
    %c0_53 = arith.constant 0 : index
    %75 = vector.load %arg10[%c8_52, %c0_53] : memref<36x256xf32, #tpu.memory_space<vmem>>, vector<4x256xf32>
    tpu.vector_store %arg10[%c8_52, %c0_53], %74 {strides = array<i32>} : memref<36x256xf32, #tpu.memory_space<vmem>>, vector<4x256xf32>,
    %c1_i32_54 = arith.constant 1 : i32
    %76 = tpu.dynamic_rotate %57 by %c1_i32_54 dim 1 : vector<4x256xf32>, i32 -> vector<4x256xf32>
    %c3_55 = arith.constant 3 : index
    %c0_56 = arith.constant 0 : index
    %c0_57 = arith.constant 0 : index
    %77 = vector.load %arg2[%c3_55, %c0_56, %c0_57] : memref<9x1x256xf32, #tpu.memory_space<vmem>>, vector<1x1x256xf32>
    %78 = vector.shape_cast %77 : vector<1x1x256xf32> to vector<1x256xf32>
    %79 = vector.broadcast %78 : vector<1x256xf32> to vector<4x256xf32>
    %80 = arith.mulf %76, %79 : vector<4x256xf32>
    %c12_58 = arith.constant 12 : index
    %c0_59 = arith.constant 0 : index
    %81 = vector.load %arg10[%c12_58, %c0_59] : memref<36x256xf32, #tpu.memory_space<vmem>>, vector<4x256xf32>
    tpu.vector_store %arg10[%c12_58, %c0_59], %80 {strides = array<i32>} : memref<36x256xf32, #tpu.memory_space<vmem>>, vector<4x256xf32>,
    %c16_60 = arith.constant 16 : index
    %c0_61 = arith.constant 0 : index
    %82 = vector.load %arg10[%c16_60, %c0_61] : memref<36x256xf32, #tpu.memory_space<vmem>>, vector<4x256xf32>
    tpu.vector_store %arg10[%c16_60, %c0_61], %57 {strides = array<i32>} : memref<36x256xf32, #tpu.memory_space<vmem>>, vector<4x256xf32>,
    %c255_i32_62 = arith.constant 255 : i32
    %83 = tpu.dynamic_rotate %57 by %c255_i32_62 dim 1 : vector<4x256xf32>, i32 -> vector<4x256xf32>
    %c5_63 = arith.constant 5 : index
    %c0_64 = arith.constant 0 : index
    %c0_65 = arith.constant 0 : index
    %84 = vector.load %arg2[%c5_63, %c0_64, %c0_65] : memref<9x1x256xf32, #tpu.memory_space<vmem>>, vector<1x1x256xf32>
    %85 = vector.shape_cast %84 : vector<1x1x256xf32> to vector<1x256xf32>
    %86 = vector.broadcast %85 : vector<1x256xf32> to vector<4x256xf32>
    %87 = arith.mulf %83, %86 : vector<4x256xf32>
    %c20_66 = arith.constant 20 : index
    %c0_67 = arith.constant 0 : index
    %88 = vector.load %arg10[%c20_66, %c0_67] : memref<36x256xf32, #tpu.memory_space<vmem>>, vector<4x256xf32>
    tpu.vector_store %arg10[%c20_66, %c0_67], %87 {strides = array<i32>} : memref<36x256xf32, #tpu.memory_space<vmem>>, vector<4x256xf32>,
    %c241_i32_68 = arith.constant 241 : i32
    %89 = tpu.dynamic_rotate %57 by %c241_i32_68 dim 1 : vector<4x256xf32>, i32 -> vector<4x256xf32>
    %c6_69 = arith.constant 6 : index
    %c0_70 = arith.constant 0 : index
    %c0_71 = arith.constant 0 : index
    %90 = vector.load %arg2[%c6_69, %c0_70, %c0_71] : memref<9x1x256xf32, #tpu.memory_space<vmem>>, vector<1x1x256xf32>
    %91 = vector.shape_cast %90 : vector<1x1x256xf32> to vector<1x256xf32>
    %92 = vector.broadcast %91 : vector<1x256xf32> to vector<4x256xf32>
    %93 = arith.mulf %89, %92 : vector<4x256xf32>
    %c24_72 = arith.constant 24 : index
    %c0_73 = arith.constant 0 : index
    %94 = vector.load %arg10[%c24_72, %c0_73] : memref<36x256xf32, #tpu.memory_space<vmem>>, vector<4x256xf32>
    tpu.vector_store %arg10[%c24_72, %c0_73], %93 {strides = array<i32>} : memref<36x256xf32, #tpu.memory_space<vmem>>, vector<4x256xf32>,
    %c240_i32_74 = arith.constant 240 : i32
    %95 = tpu.dynamic_rotate %57 by %c240_i32_74 dim 1 : vector<4x256xf32>, i32 -> vector<4x256xf32>
    %c7_75 = arith.constant 7 : index
    %c0_76 = arith.constant 0 : index
    %c0_77 = arith.constant 0 : index
    %96 = vector.load %arg2[%c7_75, %c0_76, %c0_77] : memref<9x1x256xf32, #tpu.memory_space<vmem>>, vector<1x1x256xf32>
    %97 = vector.shape_cast %96 : vector<1x1x256xf32> to vector<1x256xf32>
    %98 = vector.broadcast %97 : vector<1x256xf32> to vector<4x256xf32>
    %99 = arith.mulf %95, %98 : vector<4x256xf32>
    %c28_78 = arith.constant 28 : index
    %c0_79 = arith.constant 0 : index
    %100 = vector.load %arg10[%c28_78, %c0_79] : memref<36x256xf32, #tpu.memory_space<vmem>>, vector<4x256xf32>
    tpu.vector_store %arg10[%c28_78, %c0_79], %99 {strides = array<i32>} : memref<36x256xf32, #tpu.memory_space<vmem>>, vector<4x256xf32>,
    %c239_i32_80 = arith.constant 239 : i32
    %101 = tpu.dynamic_rotate %57 by %c239_i32_80 dim 1 : vector<4x256xf32>, i32 -> vector<4x256xf32>
    %c8_81 = arith.constant 8 : index
    %c0_82 = arith.constant 0 : index
    %c0_83 = arith.constant 0 : index
    %102 = vector.load %arg2[%c8_81, %c0_82, %c0_83] : memref<9x1x256xf32, #tpu.memory_space<vmem>>, vector<1x1x256xf32>
    %103 = vector.shape_cast %102 : vector<1x1x256xf32> to vector<1x256xf32>
    %104 = vector.broadcast %103 : vector<1x256xf32> to vector<4x256xf32>
    %105 = arith.mulf %101, %104 : vector<4x256xf32>
    %c32_84 = arith.constant 32 : index
    %c0_85 = arith.constant 0 : index
    %106 = vector.load %arg10[%c32_84, %c0_85] : memref<36x256xf32, #tpu.memory_space<vmem>>, vector<4x256xf32>
    tpu.vector_store %arg10[%c32_84, %c0_85], %105 {strides = array<i32>} : memref<36x256xf32, #tpu.memory_space<vmem>>, vector<4x256xf32>,
    %c0_86 = arith.constant 0 : index
    %c0_87 = arith.constant 0 : index
    %107 = vector.load %arg5[%c0_86, %c0_87] : memref<4x36xf32, #tpu.memory_space<vmem>>, vector<4x36xf32>
    %c0_88 = arith.constant 0 : index
    %c0_89 = arith.constant 0 : index
    %108 = vector.load %arg10[%c0_88, %c0_89] : memref<36x256xf32, #tpu.memory_space<vmem>>, vector<36x256xf32>
    %cst_90 = arith.constant dense<0.000000e+00> : vector<4x256xf32>
    %109 = tpu.matmul %107, %108, %cst_90 {dimension_numbers = #tpu.dot_dimension_numbers<[1], [0], [0], [1], [0, 0, 1, 1], [], []>, precision = #tpu.contract_precision<fp32>} : vector<4x36xf32>, vector<36x256xf32>, vector<4x256xf32> -> vector<4x256xf32>
    %c0_91 = arith.constant 0 : index
    %c0_92 = arith.constant 0 : index
    %110 = vector.load %arg6[%c0_91, %c0_92] : memref<4x1xf32, #tpu.memory_space<vmem>>, vector<4x1xf32>
    %111 = vector.broadcast %110 : vector<4x1xf32> to vector<4x256xf32>
    %112 = arith.addf %109, %111 : vector<4x256xf32>
    %cst_93 = arith.constant 0.000000e+00 : f32
    %113 = vector.broadcast %cst_93 : f32 to vector<4x256xf32>
    %114 = arith.maximumf %112, %113 : vector<4x256xf32>
    %c0_94 = arith.constant 0 : index
    %c0_95 = arith.constant 0 : index
    %115 = vector.load %arg7[%c0_94, %c0_95] : memref<4x4xf32, #tpu.memory_space<vmem>>, vector<4x4xf32>
    %cst_96 = arith.constant dense<0.000000e+00> : vector<4x256xf32>
    %116 = tpu.matmul %115, %114, %cst_96 {dimension_numbers = #tpu.dot_dimension_numbers<[1], [0], [0], [1], [0, 0, 1, 1], [], []>, precision = #tpu.contract_precision<fp32>} : vector<4x4xf32>, vector<4x256xf32>, vector<4x256xf32> -> vector<4x256xf32>
    %c0_97 = arith.constant 0 : index
    %c0_98 = arith.constant 0 : index
    %117 = vector.load %arg8[%c0_97, %c0_98] : memref<4x1xf32, #tpu.memory_space<vmem>>, vector<4x1xf32>
    %118 = vector.broadcast %117 : vector<4x1xf32> to vector<4x256xf32>
    %119 = arith.addf %116, %118 : vector<4x256xf32>
    %120 = arith.addf %119, %0 : vector<4x256xf32>
    %c0_99 = arith.constant 0 : index
    %c0_100 = arith.constant 0 : index
    %121 = vector.load %arg9[%c0_99, %c0_100] : memref<4x256xf32, #tpu.memory_space<vmem>>, vector<4x256xf32>
    tpu.vector_store %arg9[%c0_99, %c0_100], %120 {strides = array<i32>} : memref<4x256xf32, #tpu.memory_space<vmem>>, vector<4x256xf32>,
    return
  }
  func.func @transform_0(%arg0: i32) -> (i32, i32) {
    %c0_i32 = arith.constant 0 : i32
    %c0_i32_0 = arith.constant 0 : i32
    return %c0_i32, %arg0 : i32, i32
  }
  func.func @transform_1(%arg0: i32) -> (i32, i32, i32) {
    %c0_i32 = arith.constant 0 : i32
    %c0_i32_0 = arith.constant 0 : i32
    %c0_i32_1 = arith.constant 0 : i32
    %c0_i32_2 = arith.constant 0 : i32
    return %c0_i32, %c0_i32_0, %c0_i32_1 : i32, i32, i32
  }
  func.func @transform_2(%arg0: i32) -> (i32, i32) {
    %c0_i32 = arith.constant 0 : i32
    %c0_i32_0 = arith.constant 0 : i32
    %c0_i32_1 = arith.constant 0 : i32
    return %c0_i32, %c0_i32_0 : i32, i32
  }
  func.func @transform_3(%arg0: i32) -> (i32, i32) {
    %c0_i32 = arith.constant 0 : i32
    %c0_i32_0 = arith.constant 0 : i32
    %c0_i32_1 = arith.constant 0 : i32
    return %c0_i32, %c0_i32_0 : i32, i32
  }
  func.func @transform_4(%arg0: i32) -> (i32, i32) {
    %c0_i32 = arith.constant 0 : i32
    %c0_i32_0 = arith.constant 0 : i32
    %c0_i32_1 = arith.constant 0 : i32
    return %c0_i32, %c0_i32_0 : i32, i32
  }
  func.func @transform_5(%arg0: i32) -> (i32, i32) {
    %c0_i32 = arith.constant 0 : i32
    %c0_i32_0 = arith.constant 0 : i32
    %c0_i32_1 = arith.constant 0 : i32
    return %c0_i32, %c0_i32_0 : i32, i32
  }
  func.func @transform_6(%arg0: i32) -> (i32, i32) {
    %c0_i32 = arith.constant 0 : i32
    %c0_i32_0 = arith.constant 0 : i32
    %c0_i32_1 = arith.constant 0 : i32
    return %c0_i32, %c0_i32_0 : i32, i32
  }
  func.func @transform_7(%arg0: i32) -> (i32, i32) {
    %c0_i32 = arith.constant 0 : i32
    %c0_i32_0 = arith.constant 0 : i32
    %c0_i32_1 = arith.constant 0 : i32
    return %c0_i32, %c0_i32_0 : i32, i32
  }
  func.func @transform_8(%arg0: i32) -> (i32, i32) {
    %c0_i32 = arith.constant 0 : i32
    %c0_i32_0 = arith.constant 0 : i32
    return %c0_i32, %arg0 : i32, i32
  }
}

</mosaic_0001>

<bundles_post_ra>
// kernel: tpu_custom_call.1
= control target key start
LH: loop header
LB: loop body
LE: loop exit
PB: predicated region body
PF: predicated region fallthrough
CT: control target
= control target key end

     0   :  { %s2797_s0 = inlined_call_operand.hbm [shape: f32[4,512], index: 0, kind: input, shape index: {}]   ;;  %s2798_s1 = inlined_call_operand.hbm [shape: f32[9,1,256], index: 1, kind: input, shape index: {}]   ;;  %s2799_s2 = inlined_call_operand.vmem [shape: f32[4,36], index: 2, kind: input, shape index: {}]   ;;  %s2800_s3 = inlined_call_operand.vmem [shape: f32[4,1], index: 3, kind: input, shape index: {}]   ;;  %s2801_s4 = inlined_call_operand.vmem [shape: f32[4,36], index: 4, kind: input, shape index: {}]   ;;  %s2802_s5 = inlined_call_operand.vmem [shape: f32[4,1], index: 5, kind: input, shape index: {}]   ;;  %s2803_s6 = inlined_call_operand.vmem [shape: f32[4,4], index: 6, kind: input, shape index: {}]   ;;  %s2804_s7 = inlined_call_operand.vmem [shape: f32[4,1], index: 7, kind: input, shape index: {}]   ;;  %s2805_s8 = inlined_call_operand.hbm [shape: f32[4,512], index: 8, kind: output, shape index: {}]  }
   0x1   :  { %2806 = sst [smem:[#allocation13_spill]] %s2798_s1 }
   0x2   :  { %13 = vsyncpa [#allocation4], 0 }
   0x3   :  { %15 = vsyncpa [#allocation4 + $0x1], 0 }
   0x4   :  { %16 = vsyncpa [#allocation7], 0 }
   0x5   :  { %17 = vsyncpa [#allocation5], 0 }
   0x6   :  { %19 = vsyncpa [#allocation5 + $0x1], 0  ;;  %s2261_s27 = smov 0   ;;  %s2263_s28 = smov 0  }
   0x7   :  { %s2265_s29 = smov 0   ;;  %s2267_s30 = smov 0  }
   0x8 LB: > { %s2807_s1 = sld [smem:[#allocation13_spill]]  ;;  %s2285_s12 = sadd.s32 4294967295, %s2202_s30   ;;  %s2202_s30 = sphi %s2267_s30, %s2819_s30   ;;  %s2198_s29 = sphi %s2265_s29, %s2818_s29   ;;  %s2194_s28 = sphi %s2263_s28, %s2817_s28   ;;  %s2190_s27 = sphi %s2261_s27, %s2816_s27  }
   0x9   : > { %p1985_p0 = scmp.ge.s32.totalorder %s2202_s30, 1  ;;  %p46_p1 = scmp.eq.s32.totalorder %s2285_s12, 0 }
   0xa   : > { %p229_p2 = scmp.lt.s32.totalorder %s2202_s30, 3  ;;  %s2204_s14 = smov [#allocation6]  }
   0xb   : > { %s242_s15 = sshll.u32 %s2204_s14, 4  ;;  %s2205_s16 = smov 32   ;;  %s243_s15 = int_to_ptr.vmem [resolvable:$true] %s242_s15 }
   0xc   : > { %p2290_p3 = pnand %p1985_p0, %p229_p2  ;;  %s2206_s17 = smov 2  }
   0xd   : > { %s1984_s18 = sadd.s32 4294967294, %s2202_s30   ;;  %s2301_s19 = sadd.s32 1, %s2202_s30  }
   0xe   : > { %s240_s11 = sshll.u32 %s2807_s1, 4  ;;  %p2010_p4 = pneg %p2290_p3  ;;  %s241_s11 = int_to_ptr.hbm [resolvable:$true] %s240_s11 }
   0xf   : > { %s32_s20 = sadd.s32 1, %s2198_s29  ;;  %s29_s21 = ssub.s32 %s2202_s30, %s2301_s19 }
  0x10   : > { %p2011_p6 = pnand %p2010_p4, %p46_p1  ;;  %p39_p7 = scmp.ne.s32.totalorder %s2198_s29, %s2194_s28 }
  0x11   : > { %p30_p8 = scmp.eq.s32.totalorder %s29_s21, 0  ;;  %p40_p9 = scmp.eq.s32.totalorder %s2202_s30, 0 }
  0x12   : > { %2013 = dma.hbm_to_vmem [thread:$0]  (!%p2011_p6), %s241_s11, 288, %s243_s15, [#allocation7], %s2205_s16, %s2205_s16, %s2206_s17  }
  0x13   : > { %p45_p10 = scmp.ne.s32.totalorder %s2194_s28, %s2190_s27  ;;  %p216_p11 = scmp.eq.s32.totalorder %s2285_s12, 1 }
  0x14   : > { %s2313_s22 = scalar_select %p30_p8, %s2198_s29, %s32_s20  }
  0x15   : > { %p2317_p12 = por %p46_p1, %p45_p10  ;;  %p2321_p13 = por %p216_p11, %p39_p7 }
  0x16   : > { %2809 = sst [smem:[#allocation12_spill]] %s2313_s22  ;;  %p222_p0 = scmp.eq.s32.totalorder %s1984_s18, 1 }
  0x17   : > { %p41_p2 = por %p40_p9, %p39_p7  ;;  %s274_s25 = sand.u32 1, %s2198_s29  }
  0x18   : > { %p2326_p4 = por %p222_p0, %p45_p10  ;;  %p2023_p6 = scmp.lt.s32.totalorder %s2202_s30, 2 }
  0x19   : > { %s1988_s9 = sshll.u32 %s274_s25, 3  ;;  %s2000_s10 = sshll.u32 %s2202_s30, 3 }
  0x1a   : > { %s283_s15 = scalar_lea.hbm %s2797_s0, %s2000_s10  ;;  %s278_s17 = scalar_lea.vmem [#allocation3], %s1988_s9 }
  0x1b   : > { %s285_s16 = sshll.u32 %s283_s15, 4  ;;  %s287_s20 = sshll.u32 %s278_s17, 4  ;;  %s286_s16 = int_to_ptr.hbm [resolvable:$true] %s285_s16  ;;  %s288_s20 = int_to_ptr.vmem [resolvable:$true] %s287_s20 }
  0x1c   : > { %p2335_p8 = pnand %p2023_p6, %p41_p2  ;;  %s275_s21 = scalar_lea.sflag [#allocation4], %s274_s25 }
  0x1d   : > { %s2102_s1 = sshra.s32 %s286_s16, 4  ;;  %s2109_s9 = scalar_lea.hbm %s2797_s0, 16  ;;  %s2103_s1 = int_to_ptr.hbm [resolvable:$true] %s2102_s1 }
  0x1e   : > { %s2104_s22 = scalar_lea.hbm %s2103_s1, 8  ;;  %p2106_p9 = pneg %p2335_p8 }
  0x1f   : > { %p2105_p7 = scmp.ne.s32.totalorder %s2103_s1, %s2104_s22  ;;  %p2110_p0 = scmp.lt.s32.totalorder %s2103_s1, %s2797_s0 }
  0x20   : > { %p2111_p2 = scmp.lt.s32.totalorder %s2109_s9, %s2104_s22 }
  0x21   : > { %p2107_p10 = pnand %p2106_p9, %p2105_p7 }
  0x22   : > { %p2112_p6 = por %p2111_p2, %p2110_p0 }
  0x23   : > { %p2108_p11 = pneg %p2107_p10 }
  0x25   : > { %p2113_p5 = pnand %p2112_p6, %p2108_p11 }
  0x27   : > { %2116 = shalt.err (!%p2113_p5)
}
  0x28   : > { %2017 = dma.hbm_to_vmem [thread:$0]  (!%p2335_p8), %s286_s16, 128, %s288_s20, %s275_s21  }
  0x29   : > { %296 = sbr.rel (%p2290_p3) target bundleno = 918 (0x396), region = 52  ;;  %s2352_s25 = sand.u32 (!%p2290_p3), 1, %s2194_s28  }
  0x2a   : > { %s1992_s17 = sshll.u32 (!%p2290_p3), %s2352_s25, 3  ;;  %s299_s10 = scalar_lea.sflag (!%p2290_p3), [#allocation4], %s2352_s25 }
  0x2b   : > { %s302_s1 = scalar_lea.vmem (!%p2290_p3), [#allocation3], %s1992_s17 }
  0x2e   : > { %2177 = dma.done.wait (%p2317_p12), %s299_s10, 128  }
  0x2f   : > { %2179 = vsyncadd (%p2317_p12), %s299_s10, 4294967168 }
  0x30   : > { %2181 = dma.done.wait (%p46_p1), [#allocation7], 288  }
  0x31   : > { %2183 = vsyncadd (%p46_p1), [#allocation7], 4294967008  ;;  %v343_v0 = vld [vmem:[%s302_s1] sm:$0xff]  ;;  %s2207_s13 = smov 16   ;;  %s2208_s22 = smov 1   ;;  %v354_v19 = vlaneseq  ;;  %vm582_vm7 = vcmask 1043456  }
  0x32   : > { %345 = vst [vmem:[#allocation1] ss:$2 sm:$0xff] %v343_v0  ;;  %s2209_s23 = smov 127   ;;  %s2210_s16 = smov 113   ;;  %v382_v20 = vld [vmem:[#allocation6 + $0x2] sm:$0x3] }
  0x33   : > { %s2211_s20 = smov 112   ;;  %s2212_s18 = smov 17   ;;  %v2382_v21 = vand.u32 127, %v354_v19  ;;  %v384_v22 = vperm.slane %v382_v20, 0  ;;  %v385_v23 = vperm.slane %v382_v20, 1  ;;  %vm578_vm8 = vcmask 293888  }
  0x34   : > { %s2213_s21 = smov 111   ;;  %s2214_s11 = smov 15   ;;  %v434_v32 = vld [vmem:[#allocation6 + $0x6] sm:$0x3]  ;;  %v470_v44 = vld [vmem:[#allocation6 + $0xa] sm:$0x3] }
  0x35   : > { %vm378_vm0 = vcmp.lt.s32.totalorder %v2382_v21, 16  ;;  %vm430_vm1 = vcmp.lt.s32.totalorder %v2382_v21, 1  ;;  %v436_v34 = vperm.slane %v434_v32, 0  ;;  %v437_v35 = vperm.slane %v434_v32, 1  ;;  %v499_v54 = vld [vmem:[#allocation6 + $0xc] sm:$0x3] }
  0x36   : > { %vm466_vm2 = vcmp.lt.s32.totalorder %v2382_v21, 127  ;;  %v472_v45 = vperm.slane %v470_v44, 0  ;;  %v473_v46 = vperm.slane %v470_v44, 1  ;;  %vm495_vm3 = vcmp.lt.s32.totalorder %v2382_v21, 113  ;;  %v411_v19 = vld [vmem:[#allocation6 + $0x4] sm:$0x3] }
  0x37   : > { %v501_v55 = vperm.slane %v499_v54, 0  ;;  %v502_v56 = vperm.slane %v499_v54, 1  ;;  %vm518_vm4 = vcmp.lt.s32.totalorder %v2382_v21, 112  ;;  %vm547_vm5 = vcmp.lt.s32.totalorder %v2382_v21, 111  ;;  %s340_s10 = scalar_lea.vmem [#allocation8], %s1992_s17  ;;  %s2152_s17 = scalar_lea.hbm %s2805_s8, 16 }
  0x38   : > { %vm407_vm6 = vcmp.lt.s32.totalorder %v2382_v21, 15  ;;  %vm356_vm9 = vcmp.lt.s32.totalorder %v2382_v21, 17  ;;  %vm1572_vm10 = vcmask 31744   ;;  %s1901_s1 = sshll.u32 %s340_s10, 4  ;;  %s1902_s1 = int_to_ptr.vmem [resolvable:$true] %s1901_s1 }
  0x39   : > { %v346_v1 = vld.sshfl [vmem:[#allocation1] sm:$0xff pattern:$0x75316420]  ;;  %v347_v2 = vld.sshfl [vmem:[#allocation1 + $0x8] sm:$0xff pattern:$0x75316420] }
  0x3a   : > { %369 = vst [vmem:[#allocation1] ss:$2 sm:$0xff] %v343_v0 }
  0x41   : > { %v370_v3 = vld.sshfl [vmem:[#allocation1] sm:$0xff pattern:$0x75316420]  ;;  %v371_v4 = vld.sshfl [vmem:[#allocation1 + $0x8] sm:$0xff pattern:$0x75316420] }
  0x42   : > { %374 = vrot.lane.b32.xlu1 %v370_v3, %s2207_s13  ;;  %398 = vst [vmem:[#allocation1] ss:$2 sm:$0xff] %v343_v0  ;;  %376 = vrot.lane.b32.xlu2 %v371_v4, %s2207_s13 }
  0x49   : > { %v399_v5 = vld.sshfl [vmem:[#allocation1] sm:$0xff pattern:$0x75316420]  ;;  %v400_v6 = vld.sshfl [vmem:[#allocation1 + $0x8] sm:$0xff pattern:$0x75316420] }
  0x4a   : > { %421 = vst [vmem:[#allocation1] ss:$2 sm:$0xff] %v343_v0 }
  0x51   : > { %v422_v7 = vld.sshfl [vmem:[#allocation1] sm:$0xff pattern:$0x75316420]  ;;  %v423_v8 = vld.sshfl [vmem:[#allocation1 + $0x8] sm:$0xff pattern:$0x75316420] }
  0x52   : > { %428 = vrot.lane.b32.xlu0 %v423_v8, %s2208_s22  ;;  %450 = vst [vmem:[#allocation1] ss:$2 sm:$0xff] %v343_v0  ;;  %426 = vrot.lane.b32.xlu2 %v422_v7, %s2208_s22 }
  0x59   : > { %v451_v9 = vld.sshfl [vmem:[#allocation1] sm:$0xff pattern:$0x75316420]  ;;  %v452_v10 = vld.sshfl [vmem:[#allocation1 + $0x8] sm:$0xff pattern:$0x75316420] }
  0x5a   : > { %457 = vst [vmem:[#allocation1] ss:$2 sm:$0xff] %v343_v0 }
  0x5b   : > { %455 = vst [vmem:[#allocation2 + $0x48] sm:$0xf] %v451_v9  ;;  %v551_v9 = vld [vmem:[#allocation6 + $0x10] sm:$0x3] }
  0x5c   : > { %456 = vst [vmem:[#allocation2 + $0x28] sm:$0xf] %v452_v10 }
  0x61   : > { %v458_v11 = vld.sshfl [vmem:[#allocation1] sm:$0xff pattern:$0x75316420]  ;;  %v459_v12 = vld.sshfl [vmem:[#allocation1 + $0x8] sm:$0xff pattern:$0x75316420] }
  0x62   : > { %486 = vst [vmem:[#allocation1] ss:$2 sm:$0xff] %v343_v0  ;;  %462 = vrot.lane.b32.xlu2 %v458_v11, %s2209_s23 }
  0x69   : > { %v488_v13 = vld.sshfl [vmem:[#allocation1 + $0x8] sm:$0xff pattern:$0x75316420]  ;;  %v487_v14 = vld.sshfl [vmem:[#allocation1] sm:$0xff pattern:$0x75316420] }
  0x6a   : > { %493 = vrot.lane.b32.xlu1 %v488_v13, %s2210_s16  ;;  %491 = vrot.lane.b32.xlu0 %v487_v14, %s2210_s16  ;;  %509 = vst [vmem:[#allocation1] ss:$2 sm:$0xff] %v343_v0  ;;  %v554_v13 = vperm.slane %v551_v9, 1 }
  0x6b   : > { %464 = vrot.lane.b32.xlu2 %v459_v12, %s2209_s23  ;;  %v553_v12 = vperm.slane %v551_v9, 0  ;;  %v572_v9 = vld [vmem:[%s2800_s3] sm:$0xf] }
  0x71   : > { %v510_v15 = vld.sshfl [vmem:[#allocation1] sm:$0xff pattern:$0x75316420]  ;;  %v511_v16 = vld.sshfl [vmem:[#allocation1 + $0x8] sm:$0xff pattern:$0x75316420] }
  0x72   : > { %514 = vrot.lane.b32.xlu1 %v510_v15, %s2211_s20  ;;  %538 = vst [vmem:[#allocation1] ss:$2 sm:$0xff] %v343_v0 }
  0x73   : > { %350 = vrot.lane.b32.xlu2 %v346_v1, %s2212_s18 }
  0x79   : > { %v539_v17 = vld.sshfl [vmem:[#allocation1] sm:$0xff pattern:$0x75316420]  ;;  %v540_v18 = vld.sshfl [vmem:[#allocation1 + $0x8] sm:$0xff pattern:$0x75316420] }
  0x7a   : > { %516 = vrot.lane.b32.xlu1 %v511_v16, %s2211_s20  ;;  %543 = vrot.lane.b32.xlu0 %v539_v17, %s2213_s21  ;;  %1874 = vst [vmem:[#allocation1] ss:$2 sm:$0xff] %v343_v0  ;;  %v522_v0 = vld [vmem:[#allocation6 + $0xe] sm:$0x3] }
  0x7b   : > { %v524_v1 = vperm.slane %v522_v0, 0 }
  0x82   : > { %545 = vrot.lane.b32.xlu0 %v540_v18, %s2213_s21  ;;  %405 = vrot.lane.b32.xlu1 %v400_v6, %s2214_s11 }
  0x8a   : > { %403 = vrot.lane.b32.xlu0 %v399_v5, %s2214_s11 }
  0x92   : > { %352 = vrot.lane.b32.xlu0 %v347_v2, %s2212_s18  ;;  %v525_v2 = vperm.slane %v522_v0, 1 }
  0x9c   : > { %v377_v24 = vpop.permute.xlu2 %376 }
  0xac   : > { %v427_v33 = vpop.permute.xlu2 %426 }
  0xb4   : > { %v375_v25 = vpop.permute.xlu1 %374 }
  0xb5   : > { %v379_v26 = vsel %vm378_vm0, %v375_v25, %v377_v24  ;;  %v380_v27 = vsel %vm378_vm0, %v377_v24, %v375_v25  ;;  %v413_v24 = vperm.slane %v411_v19, 0  ;;  %v414_v25 = vperm.slane %v411_v19, 1 }
  0xb6   : > { %v388_v28 = vmul.f32 %v384_v22, %v380_v27  ;;  %v389_v29 = vmul.f32 %v385_v23, %v379_v26 }
  0xb8   : > { %v392_v30 = vrot.slane %v388_v28, 4  ;;  %v393_v31 = vrot.slane %v389_v29, 4 }
  0xba   : > { %396 = vst [vmem:[#allocation2 + $0x30] sm:$0xf0] %v392_v30 }
  0xbb   : > { %397 = vst [vmem:[#allocation2] sm:$0xf0] %v393_v31  ;;  %v561_v31 = vld [vmem:[%s2799_s2] sm:$0xf] }
  0xbc   : > { %v463_v41 = vpop.permute.xlu2 %462 }
  0xc4   : > { %v429_v36 = vpop.permute.xlu0 %428 }
  0xc5   : > { %v431_v37 = vsel %vm430_vm1, %v427_v33, %v429_v36  ;;  %v432_v38 = vsel %vm430_vm1, %v429_v36, %v427_v33  ;;  %v465_v47 = vpop.permute.xlu2 %464 }
  0xc6   : > { %v440_v39 = vmul.f32 %v436_v34, %v432_v38  ;;  %v441_v40 = vmul.f32 %v437_v35, %v431_v37  ;;  %v467_v48 = vsel %vm466_vm2, %v463_v41, %v465_v47  ;;  %v468_v49 = vsel %vm466_vm2, %v465_v47, %v463_v41  ;;  %v359_v35 = vld [vmem:[#allocation6] sm:$0x3] }
  0xc7   : > { %v476_v50 = vmul.f32 %v472_v45, %v467_v48  ;;  %v477_v51 = vmul.f32 %v473_v46, %v468_v49  ;;  %v361_v45 = vperm.slane %v359_v35, 0  ;;  %v362_v46 = vperm.slane %v359_v35, 1 }
  0xc8   : > { %v444_v42 = vrot.slane %v440_v39, 4  ;;  %v445_v43 = vrot.slane %v441_v40, 4  ;;  %v580_v39 = vsel %vm578_vm8, %v561_v31, 0 }
  0xc9   : > { %v480_v52 = vrot.slane %v476_v50, 4  ;;  %v481_v53 = vrot.slane %v477_v51, 4  ;;  %v2446_v50 = vand.u32 4294901760, %v580_v39 }
  0xca   : > { %448 = vst [vmem:[#allocation2 + $0x18] sm:$0xf0] %v444_v42 }
  0xcb   : > { %449 = vst [vmem:[#allocation2 + $0x10] sm:$0xf0] %v445_v43 }
  0xcc   : > { %484 = vst [vmem:[#allocation2 + $0x48] sm:$0xf0] %v480_v52 }
  0xcd   : > { %485 = vst [vmem:[#allocation2 + $0x28] sm:$0xf0] %v481_v53  ;;  %v351_v44 = vpop.permute.xlu2 %350 }
  0xd3   : > { %v566_v22 = vld [vmem:[#allocation2 + $0x48] sm:$0xff] }
  0xd4   : > { %v2417_v28 = vand.u32 4294901760, %v566_v22  ;;  %v567_v51 = vld [vmem:[#allocation2 + $0x28] sm:$0xff] }
  0xd6   : > { %v2434_v41 = vsub.f32 %v566_v22, %v2417_v28 }
  0xdc   : > { %v494_v57 = vpop.permute.xlu1 %493  ;;  %v492_v58 = vpop.permute.xlu0 %491 }
  0xdd   : > { %v496_v59 = vsel %vm495_vm3, %v492_v58, %v494_v57  ;;  %v497_v60 = vsel %vm495_vm3, %v494_v57, %v492_v58  ;;  %v644_v57 = vand.u32 4294901760, %v2434_v41 }
  0xde   : > { %v505_v61 = vmul.f32 %v501_v55, %v496_v59  ;;  %v506_v62 = vmul.f32 %v502_v56, %v497_v60 }
  0xe0   : > { %507 = vst [vmem:[#allocation2 + $0x8] sm:$0xf] %v505_v61  ;;  %v2462_v61 = vand.u32 4294901760, %v567_v51 }
  0xe1   : > { %508 = vst [vmem:[#allocation2 + $0x20] sm:$0xf] %v506_v62 }
  0xe4   : > { %v515_v63 = vpop.permute.xlu1 %514 }
  0xec   : > { %v517_v3 = vpop.permute.xlu1 %516  ;;  %v544_v4 = vpop.permute.xlu0 %543 }
  0xed   : > { %v519_v5 = vsel %vm518_vm4, %v515_v63, %v517_v3  ;;  %v520_v6 = vsel %vm518_vm4, %v517_v3, %v515_v63 }
  0xee   : > { %v528_v7 = vmul.f32 %v524_v1, %v519_v5  ;;  %v529_v8 = vmul.f32 %v525_v2, %v520_v6  ;;  %v2471_v1 = vsub.f32 %v580_v39, %v2446_v50  ;;  %v2215_v5 = vmov 0  }
  0xef   : > { %2070 = vset.pattern.permute.xlu1 %v2215_v5  ;;  %2071 = vset.pattern.permute.xlu0 %v2215_v5 }
  0xf0   : > { %v532_v10 = vrot.slane %v528_v7, 4  ;;  %v533_v11 = vrot.slane %v529_v8, 4  ;;  %v645_v7 = vsub.f32 %v2434_v41, %v644_v57  ;;  %575 = vperm.xlu1 %2070, %v572_v9   ;;  %v1566_v9 = vld [vmem:[%s2804_s7] sm:$0xf] }
  0xf2   : > { %536 = vst [vmem:[#allocation2 + $0x8] sm:$0xf0] %v532_v10 }
  0xf3   : > { %537 = vst [vmem:[#allocation2 + $0x20] sm:$0xf0] %v533_v11 }
  0xf4   : > { %v546_v14 = vpop.permute.xlu0 %545  ;;  %v406_v23 = vpop.permute.xlu1 %405 }
  0xf5   : > { %v548_v15 = vsel %vm547_vm5, %v544_v4, %v546_v14  ;;  %v549_v16 = vsel %vm547_vm5, %v546_v14, %v544_v4  ;;  %v2496_v14 = vand.u32 4294901760, %v2471_v1 }
  0xf6   : > { %v557_v17 = vmul.f32 %v553_v12, %v548_v15  ;;  %v558_v18 = vmul.f32 %v554_v13, %v549_v16  ;;  %v2493_v12 = vsub.f32 %v567_v51, %v2462_v61 }
  0xf8   : > { %559 = vst [vmem:[#allocation2 + $0x40] sm:$0xf] %v557_v17  ;;  %v842_v22 = vand.u32 4294901760, %v2493_v12 }
  0xf9   : > { %560 = vst [vmem:[#allocation2 + $0x38] sm:$0xf] %v558_v18  ;;  %v568_v20 = vld [vmem:[#allocation2 + $0x8] sm:$0xff]  ;;  %v646_v18 = vand.u32 4294901760, %v645_v7 }
  0xfa   : > { %v2415_v26 = vand.u32 4294901760, %v568_v20  ;;  %v569_v43 = vld [vmem:[#allocation2 + $0x20] sm:$0xff]  ;;  %v843_v35 = vsub.f32 %v2493_v12, %v842_v22 }
  0xfb   : > { %v2448_v53 = vand.u32 4294901760, %v569_v43 }
  0xfc   : > { %v404_v27 = vpop.permute.xlu0 %403  ;;  %v2427_v36 = vsub.f32 %v568_v20, %v2415_v26 }
  0xfd   : > { %v408_v29 = vsel %vm407_vm6, %v404_v27, %v406_v23  ;;  %v409_v30 = vsel %vm407_vm6, %v406_v23, %v404_v27  ;;  %v2477_v3 = vsub.f32 %v569_v43, %v2448_v53 }
  0xfe   : > { %v417_v32 = vmul.f32 %v413_v24, %v409_v30  ;;  %v418_v33 = vmul.f32 %v414_v25, %v408_v29  ;;  %v638_v49 = vand.u32 4294901760, %v2427_v36  ;;  %v613_v24 = vsub.f32 %v2471_v1, %v2496_v14 }
  0xff   : > { %v570_v34 = vld [vmem:[#allocation2 + $0x40] sm:$0xf]  ;;  %v836_v16 = vand.u32 4294901760, %v2477_v3 }
 0x100   : > { %419 = vst [vmem:[#allocation2 + $0x18] sm:$0xf] %v417_v32  ;;  %v584_v37 = vsel %vm582_vm7, %v570_v34, 0  ;;  %v571_v38 = vld [vmem:[#allocation2 + $0x38] sm:$0xf]  ;;  %v639_v0 = vsub.f32 %v2427_v36, %v638_v49  ;;  %v614_v39 = vand.u32 4294901760, %v613_v24 }
 0x101   : > { %420 = vst [vmem:[#allocation2 + $0x10] sm:$0xf] %v418_v33  ;;  %v2431_v40 = vand.u32 4294901760, %v584_v37  ;;  %v587_v42 = vsel %vm582_vm7, %v571_v38, 0  ;;  %v837_v29 = vsub.f32 %v2477_v3, %v836_v16  ;;  %v1047_v24 = vld [vmem:[#allocation6 + $0x6] sm:$0x3] }
 0x102   : > { %v2438_v47 = vand.u32 4294901760, %v587_v42  ;;  %v640_v13 = vand.u32 4294901760, %v639_v0 }
 0x103   : > { %601 = vmatpush.msra.mxu0 %v2431_v40  ;;  %709 = vmatpush.msra.mxu3 %v2431_v40  ;;  %v2443_v48 = vsub.f32 %v584_v37, %v2431_v40  ;;  %v838_v38 = vand.u32 4294901760, %v837_v29  ;;  %v1049_v29 = vperm.slane %v1047_v24, 0 }
 0x104   : > { %v353_v52 = vpop.permute.xlu0 %352  ;;  %v2460_v60 = vsub.f32 %v587_v42, %v2438_v47 }
 0x105   : > { %v357_v54 = vsel %vm356_vm9, %v351_v44, %v353_v52  ;;  %v358_v55 = vsel %vm356_vm9, %v353_v52, %v351_v44  ;;  %603 = vmatpush.msra.mxu0 %v2415_v26  ;;  %678 = vmatpush.msra.mxu2 %v2443_v48  ;;  %v632_v56 = vand.u32 4294901760, %v2443_v48 }
 0x106   : > { %v365_v58 = vmul.f32 %v361_v45, %v358_v55  ;;  %v366_v59 = vmul.f32 %v362_v46, %v357_v54  ;;  %711 = vmatpush.msra.mxu3 %v2415_v26  ;;  %v830_v11 = vand.u32 4294901760, %v2460_v60  ;;  %v844_v45 = vand.u32 4294901760, %v843_v35 }
 0x107   : > { %605 = vmatpush.msra.mxu0 %v2417_v28  ;;  %681 = vmatpush.msra.mxu2 %v2427_v36  ;;  %v564_v62 = vld [vmem:[#allocation2 + $0x18] sm:$0xff]  ;;  %v633_v63 = vsub.f32 %v2443_v48, %v632_v56 }
 0x108   : > { %367 = vst [vmem:[#allocation2 + $0x30] sm:$0xf] %v365_v58  ;;  %713 = vmatpush.msra.mxu3 %v2417_v28  ;;  %v2474_v2 = vand.u32 4294901760, %v564_v62  ;;  %v565_v4 = vld [vmem:[#allocation2 + $0x10] sm:$0xff]  ;;  %v831_v20 = vsub.f32 %v2460_v60, %v830_v11 }
 0x109   : > { %368 = vst [vmem:[#allocation2] sm:$0xf] %v366_v59  ;;  %684 = vmatpush.msra.mxu2 %v2434_v41  ;;  %v634_v6 = vand.u32 4294901760, %v633_v63  ;;  %v2483_v8 = vand.u32 4294901760, %v565_v4 }
 0x10a   : > { %607 = vmatpush.msra.mxu0 %v2474_v2  ;;  %715 = vmatpush.msra.mxu3 %v2474_v2  ;;  %v649_v10 = vsub.f32 %v564_v62, %v2474_v2  ;;  %v832_v33 = vand.u32 4294901760, %v831_v20 }
 0x10b   : > { %635 = vmatpush.msra.mxu1 %v634_v6  ;;  %v2500_v17 = vsub.f32 %v565_v4, %v2483_v8 }
 0x10c   : > { %687 = vmatpush.msra.mxu2 %v649_v10  ;;  %v650_v15 = vand.u32 4294901760, %v649_v10 }
 0x10d   : > { %641 = vmatpush.msra.mxu1 %v640_v13  ;;  %v848_v30 = vand.u32 4294901760, %v2500_v17  ;;  %v1109_v13 = vld [vmem:[#allocation6 + $0xe] sm:$0x3] }
 0x10e   : > { %v651_v19 = vsub.f32 %v649_v10, %v650_v15 }
 0x10f   : > { %647 = vmatpush.msra.mxu1 %v646_v18  ;;  %v562_v23 = vld [vmem:[#allocation2 + $0x30] sm:$0xff]  ;;  %v849_v42 = vsub.f32 %v2500_v17, %v848_v30 }
 0x110   : > { %v608_v25 = vand.u32 4294901760, %v562_v23  ;;  %v652_v27 = vand.u32 4294901760, %v651_v19  ;;  %v563_v31 = vld [vmem:[#allocation2] sm:$0xff] }
 0x111   : > { %v2512_v32 = vand.u32 4294901760, %v563_v31  ;;  %v850_v51 = vand.u32 4294901760, %v849_v42  ;;  %v1071_v42 = vld [vmem:[#allocation6 + $0xa] sm:$0x3] }
 0x112   : > { %609 = vmatpush.msra.mxu0 %v608_v25  ;;  %653 = vmatpush.msra.mxu1 %v652_v27  ;;  %v655_v34 = vsub.f32 %v562_v23, %v608_v25 }
 0x113   : > { %717 = vmatpush.msra.mxu3 %v608_v25  ;;  %v853_v37 = vsub.f32 %v563_v31, %v2512_v32  ;;  %615 = vmatmul.f32.vlgmr.msra.gmra.mxu0 %v614_v39 }
 0x114   : > { %739 = vmatpush.msrb.mxu0 %v632_v56  ;;  %690 = vmatpush.msra.mxu2 %v655_v34  ;;  %v656_v43 = vand.u32 4294901760, %v655_v34 }
 0x115   : > { %833 = vmatpush.msrb.mxu3 %v832_v33  ;;  %v854_v44 = vand.u32 4294901760, %v853_v37  ;;  %693 = vmatmul.f32.vlgmr.msra.gmra.mxu2 %v2471_v1 }
 0x116   : > { %743 = vmatpush.msrb.mxu0 %v638_v49  ;;  %799 = vmatpush.msrb.mxu2 %v2438_v47  ;;  %v657_v46 = vsub.f32 %v655_v34, %v656_v43 }
 0x117   : > { %839 = vmatpush.msrb.mxu3 %v838_v38  ;;  %v855_v48 = vsub.f32 %v853_v37, %v854_v44 }
 0x118   : > { %747 = vmatpush.msrb.mxu0 %v644_v57  ;;  %801 = vmatpush.msrb.mxu2 %v2448_v53  ;;  %v658_v52 = vand.u32 4294901760, %v657_v46 }
 0x119   : > { %845 = vmatpush.msrb.mxu3 %v844_v45  ;;  %v856_v36 = vand.u32 4294901760, %v855_v48  ;;  %v1073_v48 = vperm.slane %v1071_v42, 0 }
 0x11a   : > { %721 = vmatmul.f32.vlgmr.msra.gmra.mxu3 %v2496_v14  ;;  %751 = vmatpush.msrb.mxu0 %v650_v15  ;;  %v1112_v15 = vperm.slane %v1109_v13, 1 }
 0x11b   : > { %803 = vmatpush.msrb.mxu2 %v2462_v61  ;;  %851 = vmatpush.msrb.mxu3 %v850_v51  ;;  %v1074_v51 = vperm.slane %v1071_v42, 1 }
 0x11c   : > { %659 = vmatpush.msra.mxu1 %v658_v52  ;;  %755 = vmatpush.msrb.mxu0 %v656_v43 }
 0x11d   : > { %805 = vmatpush.msrb.mxu2 %v2483_v8  ;;  %857 = vmatpush.msrb.mxu3 %v856_v36 }
 0x11e   : > { %773 = vmatpush.msrb.mxu1 %v2431_v40  ;;  %876 = vmatpush.msra.mxu0 %v2460_v60 }
 0x11f   : > { %661 = vmatmul.f32.vlgmr.msra.gmra.mxu1 %v2446_v50  ;;  %971 = vmatpush.msra.mxu3 %v2438_v47 }
 0x120   : > { %775 = vmatpush.msrb.mxu1 %v2415_v26  ;;  %807 = vmatpush.msrb.mxu2 %v2512_v32 }
 0x121   : > { %813 = vmatmul.f32.vlgmr.msrb.gmra.mxu2 %v614_v39  ;;  %879 = vmatpush.msra.mxu0 %v2477_v3  ;;  %v1131_v39 = vld [vmem:[#allocation6 + $0x10] sm:$0x3] }
 0x122   : > { %937 = vmatpush.msra.mxu2 %v830_v11  ;;  %973 = vmatpush.msra.mxu3 %v2448_v53  ;;  %v1133_v45 = vperm.slane %v1131_v39, 0  ;;  %v1134_v46 = vperm.slane %v1131_v39, 1 }
 0x123   : > { %777 = vmatpush.msrb.mxu1 %v2417_v28  ;;  %757 = vmatmul.f32.vlgmr.msrb.gmra.mxu0 %v2446_v50 }
 0x124   : > { %859 = vmatmul.f32.vlgmr.msrb.gmra.mxu3 %v2446_v50  ;;  %882 = vmatpush.msra.mxu0 %v2493_v12 }
 0x125   : > { %941 = vmatpush.msra.mxu2 %v836_v16  ;;  %975 = vmatpush.msra.mxu3 %v2462_v61 }
 0x126   : > { %779 = vmatpush.msrb.mxu1 %v2474_v2  ;;  %885 = vmatpush.msra.mxu0 %v2500_v17 }
 0x127   : > { %945 = vmatpush.msra.mxu2 %v842_v22  ;;  %977 = vmatpush.msra.mxu3 %v2483_v8 }
 0x128   : > { %781 = vmatpush.msrb.mxu1 %v608_v25  ;;  %888 = vmatpush.msra.mxu0 %v853_v37 }
 0x129   : > { %783 = vmatmul.f32.vlgmr.msrb.gmra.mxu1 %v2446_v50  ;;  %949 = vmatpush.msra.mxu2 %v848_v30  ;;  %v1050_v30 = vperm.slane %v1047_v24, 1 }
 0x12a   : > { %907 = vmatpush.msra.mxu1 %v2438_v47  ;;  %979 = vmatpush.msra.mxu3 %v2512_v32 }
 0x12b   : > { %953 = vmatpush.msra.mxu2 %v854_v44  ;;  %891 = vmatmul.f32.vlgmr.msra.gmra.mxu0 %v2471_v1 }
 0x12c   : > { %909 = vmatpush.msra.mxu1 %v2448_v53  ;;  %955 = vmatmul.f32.vlgmr.msra.gmra.mxu2 %v2446_v50 }
 0x12d   : > { %981 = vmatmul.f32.vlgmr.msra.gmra.mxu3 %v2446_v50 }
 0x12e   : > { %911 = vmatpush.msra.mxu1 %v2462_v61 }
 0x130   : > { %913 = vmatpush.msra.mxu1 %v2483_v8 }
 0x132   : > { %915 = vmatpush.msra.mxu1 %v2512_v32 }
 0x133   : > { %919 = vmatmul.f32.vlgmr.msra.gmra.mxu1 %v2496_v14  ;;  %v1111_v14 = vperm.slane %v1109_v13, 0 }
 0x162   : > { %v576_v26 = vpop.permute.xlu1 %575 }
 0x190   : > { %v616_v28 = vpop.f32.mrf.mxu0 }
 0x191   : > { %v617_v40 = vadd.f32 %v616_v28, %v576_v26 }
 0x198   : > { %v694_v41 = vpop.f32.mrf.mxu2 }
 0x19c   : > { %v662_v47 = vpop.f32.mrf.mxu1 }
 0x19d   : > { %v663_v49 = vadd.f32 %v662_v47, %v617_v40  ;;  %v722_v53 = vpop.f32.mrf.mxu3 }
 0x19f   : > { %v695_v54 = vadd.f32 %v694_v41, %v663_v49 }
 0x1a0   : > { %v758_v56 = vpop.f32.mrf.mxu0 }
 0x1a1   : > { %v723_v55 = vadd.f32 %v722_v53, %v695_v54 }
 0x1a3   : > { %v759_v57 = vadd.f32 %v758_v56, %v723_v55  ;;  %v1093_v55 = vld [vmem:[#allocation6 + $0xc] sm:$0x3]  ;;  %v1009_v56 = vld [vmem:[#allocation6 + $0x2] sm:$0x3] }
 0x1a4   : > { %v814_v50 = vpop.f32.mrf.mxu2 }
 0x1a5   : > { %v815_v60 = vadd.f32 %v814_v50, %v576_v26 }
 0x1a6   : > { %v784_v58 = vpop.f32.mrf.mxu1 }
 0x1a7   : > { %v785_v59 = vadd.f32 %v784_v58, %v759_v57  ;;  %v860_v61 = vpop.f32.mrf.mxu3  ;;  %v1095_v58 = vperm.slane %v1093_v55, 0 }
 0x1a8   : > { %v861_v63 = vadd.f32 %v860_v61, %v815_v60  ;;  %v892_v0 = vpop.f32.mrf.mxu0  ;;  %v1011_v60 = vperm.slane %v1009_v56, 0  ;;  %v1012_v61 = vperm.slane %v1009_v56, 1 }
 0x1a9   : > { %v985_v62 = vmax.f32 %v785_v59, 0.0  ;;  %v1096_v59 = vperm.slane %v1093_v55, 1 }
 0x1aa   : > { %v893_v1 = vadd.f32 %v892_v0, %v861_v63  ;;  %v1031_v0 = vld [vmem:[#allocation6 + $0x4] sm:$0x3] }
 0x1ab   : > { %1063 = vst [vmem:[#allocation2 + $0x48] sm:$0xf] %v985_v62  ;;  %1065 = vrot.lane.b32.xlu0 %v985_v62, %s2209_s23  ;;  %1103 = vrot.lane.b32.xlu1 %v985_v62, %s2211_s20  ;;  %v1033_v13 = vperm.slane %v1031_v0, 0 }
 0x1ac   : > { %1125 = vrot.lane.b32.xlu2 %v985_v62, %s2213_s21 }
 0x1af   : > { %v956_v3 = vpop.f32.mrf.mxu2 }
 0x1b0   : > { %v920_v2 = vpop.f32.mrf.mxu1  ;;  %v982_v5 = vpop.f32.mrf.mxu3 }
 0x1b1   : > { %v921_v4 = vadd.f32 %v920_v2, %v893_v1 }
 0x1b3   : > { %v957_v6 = vadd.f32 %v956_v3, %v921_v4  ;;  %1003 = vrot.lane.b32.xlu0 %v985_v62, %s2207_s13  ;;  %1041 = vrot.lane.b32.xlu1 %v985_v62, %s2208_s22 }
 0x1b4   : > { %1087 = vrot.lane.b32.xlu2 %v985_v62, %s2210_s16 }
 0x1b5   : > { %v983_v7 = vadd.f32 %v982_v5, %v957_v6  ;;  %v1141_v5 = vld [vmem:[%s2801_s4] sm:$0xf] }
 0x1b7   : > { %v986_v8 = vmax.f32 %v983_v7, 0.0 }
 0x1b9   : > { %1064 = vst [vmem:[#allocation2 + $0x28] sm:$0xf] %v986_v8 }
 0x1bb   : > { %1127 = vrot.lane.b32.xlu0 %v986_v8, %s2213_s21  ;;  %1067 = vrot.lane.b32.xlu1 %v986_v8, %s2209_s23  ;;  %s2001_s21 = sshll.u32 %s2285_s12, 3  ;;  %s1888_s12 = scalar_lea.sflag [#allocation5], %s2352_s25 }
 0x1bc   : > { %1025 = vrot.lane.b32.xlu2 %v985_v62, %s2214_s11  ;;  %s1899_s15 = scalar_lea.hbm %s2805_s8, %s2001_s21 }
 0x1bd   : > { %s1903_s9 = sshll.u32 %s1899_s15, 4  ;;  %s1904_s9 = int_to_ptr.hbm [resolvable:$true] %s1903_s9 }
 0x1c3   : > { %1089 = vrot.lane.b32.xlu0 %v986_v8, %s2210_s16  ;;  %1005 = vrot.lane.b32.xlu1 %v986_v8, %s2207_s13  ;;  %s2146_s13 = sshra.s32 %s1904_s9, 4  ;;  %s2147_s13 = int_to_ptr.hbm [resolvable:$true] %s2146_s13 }
 0x1c4   : > { %1105 = vrot.lane.b32.xlu2 %v986_v8, %s2211_s20  ;;  %p2153_p12 = scmp.lt.s32.totalorder %s2147_s13, %s2805_s8 }
 0x1cb   : > { %1027 = vrot.lane.b32.xlu0 %v986_v8, %s2214_s11  ;;  %987 = vrot.lane.b32.xlu1 %v985_v62, %s2212_s18 }
 0x1cc   : > { %1043 = vrot.lane.b32.xlu2 %v986_v8, %s2208_s22  ;;  %s2148_s22 = scalar_lea.hbm %s2147_s13, 8 }
 0x1cd   : > { %p2149_p1 = scmp.ne.s32.totalorder %s2147_s13, %s2148_s22  ;;  %p2154_p8 = scmp.lt.s32.totalorder %s2152_s17, %s2148_s22 }
 0x1cf   : > { %p2150_p3 = pnand %p2149_p1, %p2321_p13  ;;  %p2155_p7 = por %p2154_p8, %p2153_p12 }
 0x1d1   : > { %p2151_p5 = pneg %p2150_p3 }
 0x1d3   : > { %1569 = vperm.xlu1 %2070, %v1566_v9   ;;  %p2156_p9 = pnand %p2155_p7, %p2151_p5 }
 0x1d4   : > { %989 = vrot.lane.b32.xlu2 %v986_v8, %s2212_s18 }
 0x206   : > { %v1126_v10 = vpop.permute.xlu2 %1125 }
 0x20e   : > { %v2581_v11 = vpop.permute.xlu2 %1087 }
 0x216   : > { %v2583_v12 = vpop.permute.xlu2 %1025 }
 0x21d   : > { %v1066_v16 = vpop.permute.xlu0 %1065  ;;  %v1104_v17 = vpop.permute.xlu1 %1103 }
 0x21e   : > { %v1106_v18 = vpop.permute.xlu2 %1105 }
 0x21f   : > { %v1107_v19 = vsel %vm518_vm4, %v1104_v17, %v1106_v18  ;;  %v1108_v20 = vsel %vm518_vm4, %v1106_v18, %v1104_v17  ;;  %v1159_v17 = vsel %vm578_vm8, %v1141_v5, 0 }
 0x220   : > { %v1115_v22 = vmul.f32 %v1111_v14, %v1107_v19  ;;  %v1116_v23 = vmul.f32 %v1112_v15, %v1108_v20  ;;  %v993_v14 = vld [vmem:[#allocation6] sm:$0x3] }
 0x222   : > { %v1119_v25 = vrot.slane %v1115_v22, 4  ;;  %v1120_v27 = vrot.slane %v1116_v23, 4  ;;  %v1034_v22 = vperm.slane %v1031_v0, 1  ;;  %v995_v23 = vperm.slane %v993_v14, 0 }
 0x224   : > { %1123 = vst [vmem:[#allocation2 + $0x8] sm:$0xf0] %v1119_v25 }
 0x225   : > { %1124 = vst [vmem:[#allocation2 + $0x20] sm:$0xf0] %v1120_v27  ;;  %v1004_v31 = vpop.permute.xlu0 %1003  ;;  %v1042_v32 = vpop.permute.xlu1 %1041 }
 0x226   : > { %v1044_v33 = vpop.permute.xlu2 %1043 }
 0x227   : > { %v1045_v34 = vsel %vm430_vm1, %v1042_v32, %v1044_v33  ;;  %v1046_v35 = vsel %vm430_vm1, %v1044_v33, %v1042_v32 }
 0x228   : > { %v1053_v37 = vmul.f32 %v1049_v29, %v1046_v35  ;;  %v1054_v38 = vmul.f32 %v1050_v30, %v1045_v34  ;;  %v996_v29 = vperm.slane %v993_v14, 1 }
 0x22a   : > { %v1057_v43 = vrot.slane %v1053_v37, 4  ;;  %v1058_v44 = vrot.slane %v1054_v38, 4 }
 0x22c   : > { %1061 = vst [vmem:[#allocation2 + $0x18] sm:$0xf0] %v1057_v43 }
 0x22d   : > { %1062 = vst [vmem:[#allocation2 + $0x10] sm:$0xf0] %v1058_v44  ;;  %v1128_v52 = vpop.permute.xlu0 %1127  ;;  %v1068_v36 = vpop.permute.xlu1 %1067 }
 0x22e   : > { %v1129_v26 = vsel %vm547_vm5, %v1126_v10, %v1128_v52  ;;  %v1130_v28 = vsel %vm547_vm5, %v1128_v52, %v1126_v10  ;;  %v1069_v40 = vsel %vm466_vm2, %v1066_v16, %v1068_v36  ;;  %v1070_v41 = vsel %vm466_vm2, %v1068_v36, %v1066_v16  ;;  %v990_v27 = vpop.permute.xlu2 %989 }
 0x22f   : > { %v1137_v47 = vmul.f32 %v1133_v45, %v1129_v26  ;;  %v1138_v49 = vmul.f32 %v1134_v46, %v1130_v28  ;;  %v1077_v54 = vmul.f32 %v1073_v48, %v1069_v40  ;;  %v1078_v53 = vmul.f32 %v1074_v51, %v1070_v41 }
 0x231   : > { %1139 = vst [vmem:[#allocation2 + $0x40] sm:$0xf] %v1137_v47  ;;  %v1081_v57 = vrot.slane %v1077_v54, 4  ;;  %v1082_v50 = vrot.slane %v1078_v53, 4 }
 0x232   : > { %1140 = vst [vmem:[#allocation2 + $0x38] sm:$0xf] %v1138_v49 }
 0x233   : > { %1085 = vst [vmem:[#allocation2 + $0x48] sm:$0xf0] %v1081_v57 }
 0x234   : > { %1086 = vst [vmem:[#allocation2 + $0x28] sm:$0xf0] %v1082_v50  ;;  %v1152_v50 = vld [vmem:[%s2802_s5] sm:$0xf] }
 0x235   : > { %v1090_v62 = vpop.permute.xlu0 %1089  ;;  %v1006_v63 = vpop.permute.xlu1 %1005  ;;  %1155 = vperm.xlu0 %2071, %v1152_v50  }
 0x236   : > { %v1091_v1 = vsel %vm495_vm3, %v2581_v11, %v1090_v62  ;;  %v1092_v2 = vsel %vm495_vm3, %v1090_v62, %v2581_v11  ;;  %v1007_v3 = vsel %vm378_vm0, %v1004_v31, %v1006_v63  ;;  %v1008_v4 = vsel %vm378_vm0, %v1006_v63, %v1004_v31 }
 0x237   : > { %v1099_v6 = vmul.f32 %v1095_v58, %v1091_v1  ;;  %v1100_v7 = vmul.f32 %v1096_v59, %v1092_v2  ;;  %v1015_v8 = vmul.f32 %v1011_v60, %v1008_v4  ;;  %v1016_v9 = vmul.f32 %v1012_v61, %v1007_v3 }
 0x238   : > { %v1150_v10 = vld [vmem:[#allocation2 + $0x40] sm:$0xf]  ;;  %v2626_v31 = vand.u32 4294901760, %v1159_v17 }
 0x239   : > { %1101 = vst [vmem:[#allocation2 + $0x8] sm:$0xf] %v1099_v6  ;;  %v1019_v15 = vrot.slane %v1015_v8, 4  ;;  %v1020_v11 = vrot.slane %v1016_v9, 4  ;;  %v1162_v16 = vsel %vm582_vm7, %v1150_v10, 0 }
 0x23a   : > { %1102 = vst [vmem:[#allocation2 + $0x20] sm:$0xf] %v1100_v7  ;;  %v2616_v18 = vand.u32 4294901760, %v1162_v16  ;;  %v1146_v19 = vld [vmem:[#allocation2 + $0x48] sm:$0xff]  ;;  %v1151_v20 = vld [vmem:[#allocation2 + $0x38] sm:$0xf] }
 0x23b   : > { %1023 = vst [vmem:[#allocation2 + $0x30] sm:$0xf0] %v1019_v15  ;;  %v2618_v24 = vand.u32 4294901760, %v1146_v19  ;;  %v1165_v25 = vsel %vm582_vm7, %v1151_v20, 0  ;;  %v1147_v46 = vld [vmem:[#allocation2 + $0x28] sm:$0xff] }
 0x23c   : > { %1024 = vst [vmem:[#allocation2] sm:$0xf0] %v1020_v11  ;;  %1179 = vmatpush.msrb.mxu0 %v2616_v18  ;;  %1287 = vmatpush.msrb.mxu3 %v2616_v18  ;;  %v2624_v30 = vsub.f32 %v1162_v16, %v2616_v18  ;;  %v2628_v34 = vand.u32 4294901760, %v1165_v25  ;;  %v2656_v41 = vand.u32 4294901760, %v1147_v46 }
 0x23d   : > { %v1028_v32 = vpop.permute.xlu0 %1027  ;;  %v988_v33 = vpop.permute.xlu1 %987  ;;  %v2642_v45 = vsub.f32 %v1146_v19, %v2618_v24 }
 0x23e   : > { %v1029_v35 = vsel %vm407_vm6, %v2583_v12, %v1028_v32  ;;  %v1030_v37 = vsel %vm407_vm6, %v1028_v32, %v2583_v12  ;;  %v991_v38 = vsel %vm356_vm9, %v988_v33, %v990_v27  ;;  %v992_v39 = vsel %vm356_vm9, %v990_v27, %v988_v33  ;;  %1256 = vmatpush.msrb.mxu2 %v2624_v30 }
 0x23f   : > { %v1037_v42 = vmul.f32 %v1033_v13, %v1030_v37  ;;  %v1038_v43 = vmul.f32 %v1034_v22, %v1029_v35  ;;  %v999_v44 = vmul.f32 %v995_v23, %v992_v39  ;;  %v1000_v48 = vmul.f32 %v996_v29, %v991_v38 }
 0x240   : > { %v1148_v51 = vld [vmem:[#allocation2 + $0x8] sm:$0xff]  ;;  %v1210_v52 = vand.u32 4294901760, %v2624_v30  ;;  %v2646_v12 = vsub.f32 %v1159_v17, %v2626_v31  ;;  %v2651_v21 = vsub.f32 %v1165_v25, %v2628_v34  ;;  %v1222_v49 = vand.u32 4294901760, %v2642_v45 }
 0x241   : > { %1039 = vst [vmem:[#allocation2 + $0x18] sm:$0xf] %v1037_v42  ;;  %v2648_v36 = vand.u32 4294901760, %v1148_v51  ;;  %v1149_v26 = vld [vmem:[#allocation2 + $0x20] sm:$0xff]  ;;  %v2675_v58 = vsub.f32 %v1147_v46, %v2656_v41 }
 0x242   : > { %1040 = vst [vmem:[#allocation2 + $0x10] sm:$0xf] %v1038_v43  ;;  %v1211_v28 = vsub.f32 %v2624_v30, %v1210_v52  ;;  %v2654_v40 = vand.u32 4294901760, %v1149_v26  ;;  %v2666_v55 = vand.u32 4294901760, %v2646_v12  ;;  %v1408_v57 = vand.u32 4294901760, %v2651_v21 }
 0x243   : > { %1001 = vst [vmem:[#allocation2 + $0x30] sm:$0xf] %v999_v44  ;;  %1181 = vmatpush.msrb.mxu0 %v2648_v36  ;;  %1289 = vmatpush.msrb.mxu3 %v2648_v36  ;;  %v1215_v47 = vsub.f32 %v1148_v51, %v2648_v36  ;;  %v1223_v60 = vsub.f32 %v2642_v45, %v1222_v49  ;;  %v1420_v5 = vand.u32 4294901760, %v2675_v58 }
 0x244   : > { %1002 = vst [vmem:[#allocation2] sm:$0xf] %v1000_v48  ;;  %v1212_v54 = vand.u32 4294901760, %v1211_v28  ;;  %v2663_v53 = vsub.f32 %v1149_v26, %v2654_v40  ;;  %v1191_v63 = vsub.f32 %v2646_v12, %v2666_v55  ;;  %v1409_v2 = vsub.f32 %v2651_v21, %v1408_v57 }
 0x245   : > { %1183 = vmatpush.msrb.mxu0 %v2618_v24  ;;  %1259 = vmatpush.msrb.mxu2 %v1215_v47  ;;  %v1216_v56 = vand.u32 4294901760, %v1215_v47  ;;  %v1224_v8 = vand.u32 4294901760, %v1223_v60  ;;  %v1421_v20 = vsub.f32 %v2675_v58, %v1420_v5 }
 0x246   : > { %1213 = vmatpush.msrb.mxu1 %v1212_v54  ;;  %1291 = vmatpush.msrb.mxu3 %v2618_v24  ;;  %v1414_v62 = vand.u32 4294901760, %v2663_v53  ;;  %v1192_v14 = vand.u32 4294901760, %v1191_v63  ;;  %v1410_v16 = vand.u32 4294901760, %v1409_v2 }
 0x247   : > { %1262 = vmatpush.msrb.mxu2 %v2642_v45  ;;  %v1217_v59 = vsub.f32 %v1215_v47, %v1216_v56  ;;  %v1422_v37 = vand.u32 4294901760, %v1421_v20  ;;  %v1570_v20 = vpop.permute.xlu1 %1569 }
 0x248   : > { %v1144_v61 = vld [vmem:[#allocation2 + $0x18] sm:$0xff]  ;;  %v1415_v13 = vsub.f32 %v2663_v53, %v1414_v62 }
 0x249   : > { %v2684_v0 = vand.u32 4294901760, %v1144_v61  ;;  %v1218_v1 = vand.u32 4294901760, %v1217_v59  ;;  %v1145_v3 = vld [vmem:[#allocation2 + $0x10] sm:$0xff] }
 0x24a   : > { %v1142_v4 = vld [vmem:[#allocation2 + $0x30] sm:$0xff]  ;;  %v2690_v6 = vand.u32 4294901760, %v1145_v3  ;;  %v1416_v29 = vand.u32 4294901760, %v1415_v13 }
 0x24b   : > { %1185 = vmatpush.msrb.mxu0 %v2684_v0  ;;  %1219 = vmatpush.msrb.mxu1 %v1218_v1  ;;  %v2693_v7 = vand.u32 4294901760, %v1142_v4  ;;  %v1227_v9 = vsub.f32 %v1144_v61, %v2684_v0  ;;  %v1143_v10 = vld [vmem:[#allocation2] sm:$0xff] }
 0x24c   : > { %1293 = vmatpush.msrb.mxu3 %v2684_v0  ;;  %v2701_v15 = vsub.f32 %v1145_v3, %v2690_v6  ;;  %v2703_v11 = vand.u32 4294901760, %v1143_v10 }
 0x24d   : > { %1187 = vmatpush.msrb.mxu0 %v2693_v7  ;;  %1225 = vmatpush.msrb.mxu1 %v1224_v8  ;;  %v1233_v17 = vsub.f32 %v1142_v4, %v2693_v7  ;;  %v1228_v19 = vand.u32 4294901760, %v1227_v9 }
 0x24e   : > { %1265 = vmatpush.msrb.mxu2 %v1227_v9  ;;  %1295 = vmatpush.msrb.mxu3 %v2693_v7  ;;  %v1426_v22 = vand.u32 4294901760, %v2701_v15  ;;  %v1431_v23 = vsub.f32 %v1143_v10, %v2703_v11 }
 0x24f   : > { %1317 = vmatpush.msra.mxu0 %v1210_v52  ;;  %v1229_v25 = vsub.f32 %v1227_v9, %v1228_v19  ;;  %v1234_v27 = vand.u32 4294901760, %v1233_v17  ;;  %1299 = vmatmul.f32.vlgmr.msrb.gmra.mxu3 %v2666_v55 }
 0x250   : > { %1411 = vmatpush.msra.mxu3 %v1410_v16  ;;  %1268 = vmatpush.msrb.mxu2 %v1233_v17  ;;  %v1427_v30 = vsub.f32 %v2701_v15, %v1426_v22  ;;  %v1432_v32 = vand.u32 4294901760, %v1431_v23 }
 0x251   : > { %1193 = vmatmul.f32.vlgmr.msrb.gmra.mxu0 %v1192_v14  ;;  %v1230_v33 = vand.u32 4294901760, %v1229_v25  ;;  %v1235_v35 = vsub.f32 %v1233_v17, %v1234_v27  ;;  %1271 = vmatmul.f32.vlgmr.msrb.gmra.mxu2 %v2646_v12 }
 0x252   : > { %1321 = vmatpush.msra.mxu0 %v1216_v56  ;;  %1377 = vmatpush.msra.mxu2 %v2628_v34  ;;  %v1428_v38 = vand.u32 4294901760, %v1427_v30  ;;  %v1433_v39 = vsub.f32 %v1431_v23, %v1432_v32 }
 0x253   : > { %1417 = vmatpush.msra.mxu3 %v1416_v29  ;;  %1231 = vmatpush.msrb.mxu1 %v1230_v33  ;;  %v1236_v42 = vand.u32 4294901760, %v1235_v35 }
 0x254   : > { %1325 = vmatpush.msra.mxu0 %v1222_v49  ;;  %1379 = vmatpush.msra.mxu2 %v2654_v40  ;;  %v1434_v43 = vand.u32 4294901760, %v1433_v39 }
 0x255   : > { %1423 = vmatpush.msra.mxu3 %v1422_v37  ;;  %1237 = vmatpush.msrb.mxu1 %v1236_v42 }
 0x256   : > { %1329 = vmatpush.msra.mxu0 %v1228_v19  ;;  %1381 = vmatpush.msra.mxu2 %v2656_v41 }
 0x257   : > { %1429 = vmatpush.msra.mxu3 %v1428_v38  ;;  %1351 = vmatpush.msra.mxu1 %v2616_v18 }
 0x258   : > { %1333 = vmatpush.msra.mxu0 %v1234_v27  ;;  %1383 = vmatpush.msra.mxu2 %v2690_v6 }
 0x259   : > { %1435 = vmatpush.msra.mxu3 %v1434_v43  ;;  %1239 = vmatmul.f32.vlgmr.msrb.gmra.mxu1 %v2626_v31 }
 0x25a   : > { %1454 = vmatpush.msrb.mxu0 %v2651_v21  ;;  %1353 = vmatpush.msra.mxu1 %v2648_v36 }
 0x25b   : > { %1549 = vmatpush.msrb.mxu3 %v2628_v34  ;;  %1385 = vmatpush.msra.mxu2 %v2703_v11 }
 0x25c   : > { %1391 = vmatmul.f32.vlgmr.msra.gmra.mxu2 %v1192_v14  ;;  %1457 = vmatpush.msrb.mxu0 %v2663_v53 }
 0x25d   : > { %1515 = vmatpush.msrb.mxu2 %v1408_v57  ;;  %1551 = vmatpush.msrb.mxu3 %v2654_v40 }
 0x25e   : > { %1355 = vmatpush.msra.mxu1 %v2618_v24  ;;  %1335 = vmatmul.f32.vlgmr.msra.gmra.mxu0 %v2626_v31  ;;  %v1565_v24 = vld [vmem:[%s2803_s6] sm:$0xf] }
 0x25f   : > { %1437 = vmatmul.f32.vlgmr.msra.gmra.mxu3 %v2626_v31  ;;  %1460 = vmatpush.msrb.mxu0 %v2675_v58  ;;  %v1574_v45 = vsel %vm1572_vm10, %v1565_v24, 0 }
 0x260   : > { %1519 = vmatpush.msrb.mxu2 %v1414_v62  ;;  %1553 = vmatpush.msrb.mxu3 %v2656_v41 }
 0x261   : > { %1357 = vmatpush.msra.mxu1 %v2684_v0  ;;  %1463 = vmatpush.msrb.mxu0 %v2701_v15 }
 0x262   : > { %1523 = vmatpush.msrb.mxu2 %v1420_v5  ;;  %1555 = vmatpush.msrb.mxu3 %v2690_v6 }
 0x263   : > { %1359 = vmatpush.msra.mxu1 %v2693_v7  ;;  %1466 = vmatpush.msrb.mxu0 %v1431_v23 }
 0x264   : > { %1361 = vmatmul.f32.vlgmr.msra.gmra.mxu1 %v2626_v31  ;;  %1527 = vmatpush.msrb.mxu2 %v1426_v22 }
 0x265   : > { %1485 = vmatpush.msrb.mxu1 %v2628_v34  ;;  %1557 = vmatpush.msrb.mxu3 %v2703_v11 }
 0x266   : > { %1531 = vmatpush.msrb.mxu2 %v1432_v32  ;;  %1469 = vmatmul.f32.vlgmr.msrb.gmra.mxu0 %v2646_v12 }
 0x267   : > { %1487 = vmatpush.msrb.mxu1 %v2654_v40  ;;  %1533 = vmatmul.f32.vlgmr.msrb.gmra.mxu2 %v2626_v31 }
 0x268   : > { %1559 = vmatmul.f32.vlgmr.msrb.gmra.mxu3 %v2626_v31  ;;  %v1599_v31 = vand.u32 4294901760, %v1574_v45 }
 0x269   : > { %1489 = vmatpush.msrb.mxu1 %v2656_v41 }
 0x26a   : > { %v1600_v36 = vsub.f32 %v1574_v45, %v1599_v31 }
 0x26b   : > { %1491 = vmatpush.msrb.mxu1 %v2690_v6 }
 0x26c   : > { %v1601_v40 = vand.u32 4294901760, %v1600_v36 }
 0x26d   : > { %1493 = vmatpush.msrb.mxu1 %v2703_v11 }
 0x26e   : > { %1497 = vmatmul.f32.vlgmr.msrb.gmra.mxu1 %v2666_v55  ;;  %v1602_v53 = vsub.f32 %v1600_v36, %v1601_v40 }
 0x270   : > { %v1603_v58 = vand.u32 4294901760, %v1602_v53 }
 0x2a7   : > { %v1156_v18 = vpop.permute.xlu0 %1155 }
 0x2ce   : > { %v1194_v34 = vpop.f32.mrf.mxu0 }
 0x2cf   : > { %v1195_v44 = vadd.f32 %v1194_v34, %v1156_v18 }
 0x2d2   : > { %v1300_v12 = vpop.f32.mrf.mxu3 }
 0x2d4   : > { %v1272_v46 = vpop.f32.mrf.mxu2 }
 0x2d6   : > { %v1240_v48 = vpop.f32.mrf.mxu1 }
 0x2d7   : > { %v1241_v51 = vadd.f32 %v1240_v48, %v1195_v44 }
 0x2d9   : > { %v1273_v52 = vadd.f32 %v1272_v46, %v1241_v51  ;;  %v1876_v46 = vld.sshfl [vmem:[#allocation1 + $0x8] sm:$0xff pattern:$0x75316420]  ;;  %v1875_v51 = vld.sshfl [vmem:[#allocation1] sm:$0xff pattern:$0x75316420] }
 0x2db   : > { %v1301_v21 = vadd.f32 %v1300_v12, %v1273_v52  ;;  %v1336_v26 = vpop.f32.mrf.mxu0 }
 0x2dd   : > { %v1337_v28 = vadd.f32 %v1336_v26, %v1301_v21 }
 0x2df   : > { %v1392_v41 = vpop.f32.mrf.mxu2 }
 0x2e0   : > { %v1393_v54 = vadd.f32 %v1392_v41, %v1156_v18 }
 0x2e1   : > { %v1362_v47 = vpop.f32.mrf.mxu1 }
 0x2e2   : > { %v1363_v49 = vadd.f32 %v1362_v47, %v1337_v28  ;;  %v1438_v55 = vpop.f32.mrf.mxu3 }
 0x2e3   : > { %v1439_v50 = vadd.f32 %v1438_v55, %v1393_v54  ;;  %v1470_v60 = vpop.f32.mrf.mxu0 }
 0x2e4   : > { %v1563_v56 = vmax.f32 %v1363_v49, 0.0 }
 0x2e5   : > { %v1471_v62 = vadd.f32 %v1470_v60, %v1439_v50 }
 0x2e6   : > { %v1577_v57 = vsel %vm582_vm7, %v1563_v56, 0 }
 0x2e7   : > { %v1597_v59 = vand.u32 4294901760, %v1577_v57 }
 0x2e9   : > { %v1624_v61 = vsub.f32 %v1577_v57, %v1597_v59  ;;  %1598 = vmatpush.msra.mxu0 %v1597_v59  ;;  %1674 = vmatpush.msra.mxu3 %v1597_v59 }
 0x2ea   : > { %1604 = vmatmul.f32.vlgmr.msra.gmra.mxu0 %v1603_v58  ;;  %1678 = vmatmul.f32.vlgmr.msra.gmra.mxu3 %v1601_v40  ;;  %v1534_v0 = vpop.f32.mrf.mxu2 }
 0x2eb   : > { %v1498_v63 = vpop.f32.mrf.mxu1  ;;  %1651 = vmatpush.msra.mxu2 %v1624_v61  ;;  %v1625_v1 = vand.u32 4294901760, %v1624_v61  ;;  %v1560_v3 = vpop.f32.mrf.mxu3 }
 0x2ec   : > { %v1499_v2 = vadd.f32 %v1498_v63, %v1471_v62  ;;  %1654 = vmatmul.f32.vlgmr.msra.gmra.mxu2 %v1600_v36 }
 0x2ed   : > { %1700 = vmatpush.msrb.mxu0 %v1625_v1  ;;  %v1626_v4 = vsub.f32 %v1624_v61, %v1625_v1 }
 0x2ee   : > { %v1535_v5 = vadd.f32 %v1534_v0, %v1499_v2 }
 0x2ef   : > { %v1627_v6 = vand.u32 4294901760, %v1626_v4 }
 0x2f0   : > { %v1561_v7 = vadd.f32 %v1560_v3, %v1535_v5 }
 0x2f1   : > { %1628 = vmatpush.msra.mxu1 %v1627_v6 }
 0x2f2   : > { %v1564_v8 = vmax.f32 %v1561_v7, 0.0  ;;  %1630 = vmatmul.f32.vlgmr.msra.gmra.mxu1 %v1599_v31  ;;  %1702 = vmatmul.f32.vlgmr.msrb.gmra.mxu0 %v1599_v31 }
 0x2f3   : > { %1722 = vmatpush.msrb.mxu1 %v1597_v59 }
 0x2f4   : > { %v1580_v9 = vsel %vm582_vm7, %v1564_v8, 0 }
 0x2f5   : > { %v1743_v10 = vand.u32 4294901760, %v1580_v9 }
 0x2f7   : > { %v1770_v13 = vsub.f32 %v1580_v9, %v1743_v10  ;;  %1744 = vmatpush.msrb.mxu2 %v1743_v10  ;;  %1820 = vmatpush.msra.mxu1 %v1743_v10 }
 0x2f8   : > { %1750 = vmatmul.f32.vlgmr.msrb.gmra.mxu2 %v1603_v58 }
 0x2f9   : > { %1797 = vmatpush.msra.mxu0 %v1770_v13  ;;  %v1771_v14 = vand.u32 4294901760, %v1770_v13 }
 0x2fa   : > { %1724 = vmatmul.f32.vlgmr.msrb.gmra.mxu1 %v1599_v31  ;;  %1800 = vmatmul.f32.vlgmr.msra.gmra.mxu0 %v1600_v36 }
 0x2fb   : > { %1846 = vmatpush.msra.mxu2 %v1771_v14  ;;  %v1772_v15 = vsub.f32 %v1770_v13, %v1771_v14 }
 0x2fd   : > { %v1773_v11 = vand.u32 4294901760, %v1772_v15 }
 0x2ff   : > { %1774 = vmatpush.msrb.mxu3 %v1773_v11 }
 0x300   : > { %1776 = vmatmul.f32.vlgmr.msrb.gmra.mxu3 %v1599_v31  ;;  %1848 = vmatmul.f32.vlgmr.msra.gmra.mxu2 %v1599_v31 }
 0x301   : > { %1868 = vmatpush.msra.mxu3 %v1743_v10 }
 0x302   : > { %1824 = vmatmul.f32.vlgmr.msra.gmra.mxu1 %v1601_v40 }
 0x308   : > { %1870 = vmatmul.f32.vlgmr.msra.gmra.mxu3 %v1599_v31 }
 0x367   : > { %v1605_v16 = vpop.f32.mrf.mxu0 }
 0x368   : > { %v1606_v22 = vadd.f32 %v1605_v16, %v1570_v20 }
 0x36d   : > { %v1679_v23 = vpop.f32.mrf.mxu3 }
 0x36f   : > { %v1631_v17 = vpop.f32.mrf.mxu1  ;;  %v1655_v19 = vpop.f32.mrf.mxu2 }
 0x370   : > { %v1703_v25 = vpop.f32.mrf.mxu0  ;;  %v1632_v27 = vadd.f32 %v1631_v17, %v1606_v22 }
 0x372   : > { %v1656_v32 = vadd.f32 %v1655_v19, %v1632_v27 }
 0x374   : > { %v1680_v38 = vadd.f32 %v1679_v23, %v1656_v32 }
 0x376   : > { %v1704_v24 = vadd.f32 %v1703_v25, %v1680_v38 }
 0x377   : > { %v1725_v29 = vpop.f32.mrf.mxu1 }
 0x378   : > { %v1801_v37 = vpop.f32.mrf.mxu0  ;;  %v1726_v48 = vadd.f32 %v1725_v29, %v1704_v24 }
 0x37a   : > { %v1879_v12 = vadd.f32 %v1875_v51, %v1726_v48 }
 0x37b   : > { %v1751_v30 = vpop.f32.mrf.mxu2 }
 0x37c   : > { %v1752_v33 = vadd.f32 %v1751_v30, %v1570_v20 }
 0x37f   : > { %v1825_v42 = vpop.f32.mrf.mxu1 }
 0x383   : > { %v1777_v35 = vpop.f32.mrf.mxu3  ;;  %v1849_v18 = vpop.f32.mrf.mxu2 }
 0x384   : > { %v1778_v39 = vadd.f32 %v1777_v35, %v1752_v33 }
 0x386   : > { %v1802_v43 = vadd.f32 %v1801_v37, %v1778_v39 }
 0x388   : > { %v1826_v34 = vadd.f32 %v1825_v42, %v1802_v43 }
 0x38a   : > { %v1850_v44 = vadd.f32 %v1849_v18, %v1826_v34 }
 0x38b   : > { %v1871_v45 = vpop.f32.mrf.mxu3 }
 0x38c   : > { %v1872_v31 = vadd.f32 %v1871_v45, %v1850_v44 }
 0x38e   : > { %v1880_v52 = vadd.f32 %v1876_v46, %v1872_v31 }
 0x390   : > { %v1883_v36 = vrot.slane %v1880_v52, 4 }
 0x392   : > { %v1884_v21 = vsel %vm582_vm7, %v1879_v12, %v1883_v36 }
 0x393   : > { %1886 = vst [vmem:[%s340_s10] sm:$0xff] %v1884_v21 }
 0x394   : > { %2159 = shalt.err (!%p2156_p9)
}
 0x395   : > { %2008 = dma.vmem_to_hbm [thread:$0]  (%p2321_p13), %s1902_s1, 128, %s1904_s9, %s1888_s12  }
 0x396 PF: > { %s1915_s25 = sand.u32 1, %s2190_s27   ;;  %p2814_p10 = scmp.ge.s32.totalorder %s2202_s30, 2 }
 0x397   : > { %s1916_s21 = scalar_lea.sflag [#allocation5], %s1915_s25 }
 0x398   : > { %p2019_p11 = pnand %p2814_p10, %p2326_p4 }
 0x39a   : > { %p2020_p0 = pneg %p2019_p11 }
 0x39c   : > { %2185 = dma.done.wait (%p2020_p0), %s1916_s21, 128  }
 0x39d   : > { %2187 = vsyncadd (%p2020_p0), %s1916_s21, 4294967168  ;;  %s2815_s11 = sld [smem:[#allocation12_spill]]  ;;  %p22_p2 = scmp.ge.s32.totalorder %s2301_s19, 4  }
 0x39e   : > { %s2816_s27 = smov %s2194_s28  ;;  %s2817_s28 = smov %s2198_s29 }
 0x39f   : > { %s2819_s30 = smov %s2301_s19  ;;  %24 = sbr.rel (!%p22_p2) target bundleno = 8 (0x8), region = 108 }
 0x3a3   : > { %s2818_s29 = smov %s2815_s11 }
 0x3a4   :  { %1922 = vsyncpa [#allocation4], 1 }
 0x3a5   :  { %1924 = vsyncpa [#allocation4 + $0x1], 1 }
 0x3a6   :  { %1925 = vsyncpa [#allocation7], 1 }
 0x3a7   :  { %1926 = vsyncpa [#allocation5], 1 }
 0x3a8   :  { %1928 = vsyncpa [#allocation5 + $0x1], 1 }

</bundles_post_ra>
